<compile_context>
chip_gen: v7x
topology: tpu7x:2x2x1
jax: 0.10.0
libtpu: 0.0.40
codegen_flags: <defaults>
</compile_context>

<pallas_src>
import math

import jax
import jax.numpy as jnp
from jax import lax
from jax.experimental import pallas as pl
from jax.experimental.pallas import tpu as pltpu

LANES = 128


def _cpad(c):
    return ((c + LANES - 1) // LANES) * LANES


# ----------------------------------------------------------------------------
# In-kernel conv helper: im2col patch (rows, 9*Cp) -> single MXU matmul
# ----------------------------------------------------------------------------
def _im2col_conv(xp_bf16, w_bf16, Ho, Wo, stride):
    """3x3 conv over an already spatially-padded bf16 NHWC tile.

    xp_bf16: (1, Hp, Wp, Cp)   halo included, channels lane-padded
    w_bf16 : (9*Cp, Cpo)       HWIO flattened over (kh, kw, cin)
    returns: (Ho*Wo, Cpo) float32
    """
    Cp = xp_bf16.shape[-1]
    taps = []
    for kh in range(3):
        for kw in range(3):
            if stride == 1:
                t = xp_bf16[:, kh:kh + Ho, kw:kw + Wo, :]
            else:
                t = lax.slice(
                    xp_bf16,
                    (0, kh, kw, 0),
                    (1, kh + stride * (Ho - 1) + 1,
                     kw + stride * (Wo - 1) + 1, Cp),
                    (1, stride, stride, 1))
            taps.append(t.reshape(Ho * Wo, Cp))
    patch = jnp.concatenate(taps, axis=-1)            # (rows, 9*Cp) bf16
    return jnp.dot(patch, w_bf16, preferred_element_type=jnp.float32)


# ----------------------------------------------------------------------------
# Pallas kernels
# ----------------------------------------------------------------------------
def _make_conv_relu_kernel(stride):
    """conv3x3(stride) + bias + ReLU; padded-layout input and output."""

    def kernel(x_ref, w_ref, b_ref, out_ref):
        Ho = out_ref.shape[1] - 2
        Wo = out_ref.shape[2] - 2
        Cpo = out_ref.shape[3]

        xp = x_ref[...].astype(jnp.bfloat16)          # (1, H+2, W+2, Cpi)
        acc = _im2col_conv(xp, w_ref[...], Ho, Wo, stride)
        acc = jnp.maximum(acc + b_ref[...], 0.0)      # f32 epilogue

        out_ref[...] = jnp.zeros_like(out_ref)        # zero halo for next conv
        out_ref[:, 1:Ho + 1, 1:Wo + 1, :] = (
            acc.reshape(1, Ho, Wo, Cpo).astype(out_ref.dtype))

    return kernel


def _make_conv_shortcut_kernel(stride, combine, has_proj):
    """conv3x3(y, stride=1) + bias, fused shortcut(x) (identity or 1x1
    projection, stride s), residual combine ('add'|'minus'|'mul'), ReLU."""

    def kernel(*refs):
        if has_proj:
            y_ref, x_ref, w2_ref, b2_ref, w3_ref, b3_ref, out_ref = refs
        else:
            y_ref, x_ref, w2_ref, b2_ref, out_ref = refs
        Ho = out_ref.shape[1] - 2
        Wo = out_ref.shape[2] - 2
        Cpo = out_ref.shape[3]

        # main branch: conv2 over y (y already carries its zero halo)
        yp = y_ref[...].astype(jnp.bfloat16)
        acc = _im2col_conv(yp, w2_ref[...], Ho, Wo, 1) + b2_ref[...]

        # shortcut branch from the (padded) block input x
        x = x_ref[...]                                # (1, H+2, W+2, Cpi) f32
        Cpi = x.shape[-1]
        if stride == 1:
            xi = x[:, 1:Ho + 1, 1:Wo + 1, :]
        else:
            xi = lax.slice(x, (0, 1, 1, 0),
                           (1, 1 + stride * (Ho - 1) + 1,
                            1 + stride * (Wo - 1) + 1, Cpi),
                           (1, stride, stride, 1))
        xi = xi.reshape(Ho * Wo, Cpi)
        if has_proj:
            sc = jnp.dot(xi.astype(jnp.bfloat16), w3_ref[...],
                         preferred_element_type=jnp.float32) + b3_ref[...]
        else:
            sc = xi                                   # identity (Cpi == Cpo)

        if combine == 'add':
            acc = sc + acc
        elif combine == 'minus':
            acc = sc - acc
        elif combine == 'mul':
            acc = sc * acc

        acc = jnp.maximum(acc, 0.0)
        out_ref[...] = jnp.zeros_like(out_ref)
        out_ref[:, 1:Ho + 1, 1:Wo + 1, :] = (
            acc.reshape(1, Ho, Wo, Cpo).astype(out_ref.dtype))

    return kernel


# ----------------------------------------------------------------------------
# pallas_call wrappers
# ----------------------------------------------------------------------------
def _per_batch_spec(shape):
    return pl.BlockSpec((1,) + tuple(shape[1:]), lambda n: (n, 0, 0, 0))


def _bcast_spec(shape):
    nd = len(shape)
    return pl.BlockSpec(tuple(shape), lambda n: (0,) * nd)


def _compiler_params():
    return pltpu.CompilerParams(dimension_semantics=("parallel",),
                                vmem_limit_bytes=32 * 1024 * 1024)


def conv3x3_relu(x_pad, w, b, *, stride):
    """x_pad: (N, H+2, W+2, Cpi) f32 with zero halo; w: (9*Cpi, Cpo) bf16."""
    N, Hp, Wp, Cpi = x_pad.shape
    H, W = Hp - 2, Wp - 2
    Ho = (H - 1) // stride + 1
    Wo = (W - 1) // stride + 1
    Cpo = int(w.shape[-1])
    out_shape = jax.ShapeDtypeStruct((N, Ho + 2, Wo + 2, Cpo), jnp.float32)
    flops = 2 * N * Ho * Wo * int(w.shape[0]) * Cpo
    bytes_accessed = (x_pad.size * 4 + w.size * 2 + b.size * 4
                      + N * (Ho + 2) * (Wo + 2) * Cpo * 4)
    return pl.pallas_call(
        _make_conv_relu_kernel(stride),
        grid=(N,),
        in_specs=[_per_batch_spec(x_pad.shape), _bcast_spec(w.shape),
                  _bcast_spec(b.shape)],
        out_specs=_per_batch_spec(out_shape.shape),
        out_shape=out_shape,
        compiler_params=_compiler_params(),
        cost_estimate=pl.CostEstimate(flops=int(flops), transcendentals=0,
                                      bytes_accessed=int(bytes_accessed)),
    )(x_pad, w, b)


def conv3x3_shortcut(y_pad, x_pad, w2, b2, w3, b3, *, stride, combine):
    """Fused conv2 + shortcut + combine + ReLU.  y_pad: conv1 output (padded),
    x_pad: block input (padded).  w3/b3 may be None (identity shortcut)."""
    N, Hyp, Wyp, Cpo = y_pad.shape
    Ho, Wo = Hyp - 2, Wyp - 2
    Cpi = int(x_pad.shape[-1])
    has_proj = w3 is not None

    inputs = [y_pad, x_pad, w2, b2]
    in_specs = [_per_batch_spec(y_pad.shape), _per_batch_spec(x_pad.shape),
                _bcast_spec(w2.shape), _bcast_spec(b2.shape)]
    flops = 2 * N * Ho * Wo * int(w2.shape[0]) * Cpo
    bytes_accessed = ((y_pad.size + x_pad.size) * 4 + w2.size * 2
                      + b2.size * 4 + N * Hyp * Wyp * Cpo * 4)
    if has_proj:
        inputs += [w3, b3]
        in_specs += [_bcast_spec(w3.shape), _bcast_spec(b3.shape)]
        flops += 2 * N * Ho * Wo * Cpi * Cpo
        bytes_accessed += w3.size * 2 + b3.size * 4

    out_shape = jax.ShapeDtypeStruct((N, Ho + 2, Wo + 2, Cpo), jnp.float32)
    return pl.pallas_call(
        _make_conv_shortcut_kernel(stride, combine, has_proj),
        grid=(N,),
        in_specs=in_specs,
        out_specs=_per_batch_spec(out_shape.shape),
        out_shape=out_shape,
        compiler_params=_compiler_params(),
        cost_estimate=pl.CostEstimate(flops=int(flops), transcendentals=0,
                                      bytes_accessed=int(bytes_accessed)),
    )(*inputs)


# ----------------------------------------------------------------------------
# Parameter preparation: pad channels to 128 lanes, fold (kh,kw,cin) into K,
# cast matmul operands to bf16 (accumulation stays f32 in-kernel).
# ----------------------------------------------------------------------------
def _prepare_block_params(p):
    w1 = p['w1']                                     # (3,3,Cin,Cout) HWIO f32
    Cin, Cout = int(w1.shape[2]), int(w1.shape[3])
    Cpi, Cpo = _cpad(Cin), _cpad(Cout)

    w1p = jnp.pad(w1, ((0, 0), (0, 0), (0, Cpi - Cin), (0, Cpo - Cout)))
    w1p = w1p.reshape(9 * Cpi, Cpo).astype(jnp.bfloat16)
    b1p = jnp.pad(p['b1'], (0, Cpo - Cout)).reshape(1, Cpo).astype(jnp.float32)

    w2 = p['w2']                                     # (3,3,Cout,Cout)
    w2p = jnp.pad(w2, ((0, 0), (0, 0), (0, Cpo - Cout), (0, Cpo - Cout)))
    w2p = w2p.reshape(9 * Cpo, Cpo).astype(jnp.bfloat16)
    b2p = jnp.pad(p['b2'], (0, Cpo - Cout)).reshape(1, Cpo).astype(jnp.float32)

    if p['w3'] is not None:
        w3p = jnp.pad(p['w3'], ((0, Cpi - Cin), (0, Cpo - Cout))).astype(jnp.bfloat16)
        b3p = jnp.pad(p['b3'], (0, Cpo - Cout)).reshape(1, Cpo).astype(jnp.float32)
    else:
        w3p, b3p = None, None
    return dict(w1=w1p, b1=b1p, w2=w2p, b2=b2p, w3=w3p, b3=b3p)


# ----------------------------------------------------------------------------
# Residual block / ResNetBlock forward
# ----------------------------------------------------------------------------
def residual_block_forward(x_pad, pp, *, stride=1, residual='add'):
    y = conv3x3_relu(x_pad, pp['w1'], pp['b1'], stride=stride)   # conv1 + ReLU
    if residual == 'identity':
        # PyTorch: out = relu(conv2(y)); shortcut branch unused.
        return conv3x3_relu(y, pp['w2'], pp['b2'], stride=1)
    if residual == 'concat':
        # TODO(synk): 'concat' residual changes the channel count and is not
        # fused into the conv kernel here.
        raise NotImplementedError("residual='concat' not implemented")
    return conv3x3_shortcut(y, x_pad, pp['w2'], pp['b2'], pp['w3'], pp['b3'],
                            stride=stride, combine=residual)


def resnet_block_forward(x_nchw, params, *, stride=1, residual='add'):
    N, Cin, H, W = x_nchw.shape
    Cpi = _cpad(Cin)
    Cout = int(params[-1]['w2'].shape[-1])
    x = jnp.transpose(x_nchw, (0, 2, 3, 1))          # NCHW -> NHWC
    # single pad for the whole stack: 1-px spatial halo + lane-dense channels
    x = jnp.pad(x, ((0, 0), (1, 1), (1, 1), (0, Cpi - Cin)))
    for i, p in enumerate(params):
        s = stride if i == 0 else 1
        x = residual_block_forward(x, _prepare_block_params(p),
                                   stride=s, residual=residual)
    out = x[:, 1:-1, 1:-1, :Cout]                    # drop halo + channel pad
    return jnp.transpose(out, (0, 3, 1, 2))          # NHWC -> NCHW


# ----------------------------------------------------------------------------
# Deterministic parameter init (matches nn.init.xavier_uniform_ + zero bias)
# ----------------------------------------------------------------------------
def _xavier_uniform_oihw(key, out_c, in_c, kh, kw):
    fan_in = in_c * kh * kw
    fan_out = out_c * kh * kw
    bound = math.sqrt(6.0 / (fan_in + fan_out))
    return jax.random.uniform(key, (out_c, in_c, kh, kw), jnp.float32,
                              -bound, bound)


def init_resnet_block_params(key, input_channels, output_channels, num_blocks):
    blocks = []
    c_in = input_channels
    for _ in range(num_blocks):
        key, k1, k2, k3 = jax.random.split(key, 4)
        w1 = _xavier_uniform_oihw(k1, output_channels, c_in, 3, 3)
        w2 = _xavier_uniform_oihw(k2, output_channels, output_channels, 3, 3)
        p = {
            'w1': jnp.transpose(w1, (2, 3, 1, 0)),        # OIHW -> HWIO
            'b1': jnp.zeros((output_channels,), jnp.float32),
            'w2': jnp.transpose(w2, (2, 3, 1, 0)),
            'b2': jnp.zeros((output_channels,), jnp.float32),
        }
        if c_in != output_channels:
            w3 = _xavier_uniform_oihw(k3, output_channels, c_in, 1, 1)
            p['w3'] = jnp.transpose(w3[:, :, 0, 0], (1, 0))  # (Cin, Cout)
            p['b3'] = jnp.zeros((output_channels,), jnp.float32)
        else:
            p['w3'] = None
            p['b3'] = None
        blocks.append(p)
        c_in = output_channels
    return blocks


# ----------------------------------------------------------------------------
# Pure-JAX reference (lax.conv, f32) for correctness check
# ----------------------------------------------------------------------------
def _ref_conv3x3(x, w_hwio, b, stride):
    y = lax.conv_general_dilated(x, w_hwio, (stride, stride), ((1, 1), (1, 1)),
                                 dimension_numbers=('NHWC', 'HWIO', 'NHWC'))
    return y + b


def _ref_block(x, p, stride, residual):
    y = jax.nn.relu(_ref_conv3x3(x, p['w1'], p['b1'], stride))
    y = _ref_conv3x3(y, p['w2'], p['b2'], 1)
    if p['w3'] is not None:
        w3 = p['w3'].reshape(1, 1, *p['w3'].shape)
        sc = lax.conv_general_dilated(x, w3, (stride, stride), ((0, 0), (0, 0)),
                                      dimension_numbers=('NHWC', 'HWIO', 'NHWC'))
        sc = sc + p['b3']
    else:
        sc = x[:, ::stride, ::stride, :]
    if residual == 'add':
        out = sc + y
    elif residual == 'minus':
        out = sc - y
    elif residual == 'mul':
        out = sc * y
    else:  # identity
        out = y
    return jax.nn.relu(out)


def _ref_forward(x_nchw, params, stride, residual):
    x = jnp.transpose(x_nchw, (0, 2, 3, 1))
    for i, p in enumerate(params):
        x = _ref_block(x, p, stride if i == 0 else 1, residual)
    return jnp.transpose(x, (0, 3, 1, 2))


# ----------------------------------------------------------------------------
if __name__ == "__main__":
    key = jax.random.PRNGKey(0)
    kx, kp = jax.random.split(key)

    # ResNetBlock(input_channels=4, output_channels=8, num_blocks=2,
    #             stride=1, residual='add')
    N, Cin, H, W = 2, 4, 16, 16
    Cout, num_blocks, stride, residual = 8, 2, 1, 'add'

    x = jax.random.normal(kx, (N, Cin, H, W), jnp.float32)
    params = init_resnet_block_params(kp, Cin, Cout, num_blocks)

    out = resnet_block_forward(x, params, stride=stride, residual=residual)
    out = jax.block_until_ready(out)

    assert out.shape == (N, Cout, H, W), out.shape

    ref = _ref_forward(x, params, stride, residual)
    max_err = float(jnp.max(jnp.abs(out - ref)))
    # bf16 MXU operands (f32 accumulation) -> relaxed tolerance vs f32 reference
    assert max_err < 5e-2, max_err

    print("KERNEL_OK")
</pallas_src>

<mosaic_0001>
module attributes {stable_mosaic.version = 11 : i64} {
  func.func @kernel(%arg0: i32, %arg1: memref<1x18x18x128xf32, #tpu.memory_space<vmem>>, %arg2: memref<1152x128xbf16, #tpu.memory_space<vmem>>, %arg3: memref<1x128xf32, #tpu.memory_space<vmem>>, %arg4: memref<1x18x18x128xf32, #tpu.memory_space<vmem>>) attributes {dimension_semantics = [#tpu.dimension_semantics<parallel>], iteration_bounds = array<i64: 2>, scalar_prefetch = 0 : i64, scratch_operands = 0 : i64, tpu.core_type = #tpu.core_type<tc>, window_params = [{transform_indices = @transform_0, window_bounds = array<i64: 1, 18, 18, 128>}, {pipeline_mode = #tpu.pipeline_mode<synchronous>, transform_indices = @transform_1, window_bounds = array<i64: 1152, 128>}, {pipeline_mode = #tpu.pipeline_mode<synchronous>, transform_indices = @transform_2, window_bounds = array<i64: 1, 128>}, {transform_indices = @transform_3, window_bounds = array<i64: 1, 18, 18, 128>}]} {
    %c0 = arith.constant 0 : index
    %c0_0 = arith.constant 0 : index
    %c0_1 = arith.constant 0 : index
    %c0_2 = arith.constant 0 : index
    %0 = vector.load %arg1[%c0, %c0_0, %c0_1, %c0_2] : memref<1x18x18x128xf32, #tpu.memory_space<vmem>>, vector<1x18x18x128xf32>
    %1 = arith.truncf %0 : vector<1x18x18x128xf32> to vector<1x18x18x128xbf16>
    %c0_3 = arith.constant 0 : index
    %c0_4 = arith.constant 0 : index
    %2 = vector.load %arg2[%c0_3, %c0_4] : memref<1152x128xbf16, #tpu.memory_space<vmem>>, vector<1152x128xbf16>
    %3 = vector.extract_strided_slice %1 {offsets = [0, 0, 0, 0], sizes = [1, 16, 16, 128], strides = [1, 1, 1, 1]} : vector<1x18x18x128xbf16> to vector<1x16x16x128xbf16>
    %4 = vector.shape_cast %3 : vector<1x16x16x128xbf16> to vector<256x128xbf16>
    %5 = vector.extract_strided_slice %1 {offsets = [0, 0, 1, 0], sizes = [1, 16, 16, 128], strides = [1, 1, 1, 1]} : vector<1x18x18x128xbf16> to vector<1x16x16x128xbf16>
    %6 = vector.shape_cast %5 : vector<1x16x16x128xbf16> to vector<256x128xbf16>
    %7 = vector.extract_strided_slice %1 {offsets = [0, 0, 2, 0], sizes = [1, 16, 16, 128], strides = [1, 1, 1, 1]} : vector<1x18x18x128xbf16> to vector<1x16x16x128xbf16>
    %8 = vector.shape_cast %7 : vector<1x16x16x128xbf16> to vector<256x128xbf16>
    %9 = vector.extract_strided_slice %1 {offsets = [0, 1, 0, 0], sizes = [1, 16, 16, 128], strides = [1, 1, 1, 1]} : vector<1x18x18x128xbf16> to vector<1x16x16x128xbf16>
    %10 = vector.shape_cast %9 : vector<1x16x16x128xbf16> to vector<256x128xbf16>
    %11 = vector.extract_strided_slice %1 {offsets = [0, 1, 1, 0], sizes = [1, 16, 16, 128], strides = [1, 1, 1, 1]} : vector<1x18x18x128xbf16> to vector<1x16x16x128xbf16>
    %12 = vector.shape_cast %11 : vector<1x16x16x128xbf16> to vector<256x128xbf16>
    %13 = vector.extract_strided_slice %1 {offsets = [0, 1, 2, 0], sizes = [1, 16, 16, 128], strides = [1, 1, 1, 1]} : vector<1x18x18x128xbf16> to vector<1x16x16x128xbf16>
    %14 = vector.shape_cast %13 : vector<1x16x16x128xbf16> to vector<256x128xbf16>
    %15 = vector.extract_strided_slice %1 {offsets = [0, 2, 0, 0], sizes = [1, 16, 16, 128], strides = [1, 1, 1, 1]} : vector<1x18x18x128xbf16> to vector<1x16x16x128xbf16>
    %16 = vector.shape_cast %15 : vector<1x16x16x128xbf16> to vector<256x128xbf16>
    %17 = vector.extract_strided_slice %1 {offsets = [0, 2, 1, 0], sizes = [1, 16, 16, 128], strides = [1, 1, 1, 1]} : vector<1x18x18x128xbf16> to vector<1x16x16x128xbf16>
    %18 = vector.shape_cast %17 : vector<1x16x16x128xbf16> to vector<256x128xbf16>
    %19 = vector.extract_strided_slice %1 {offsets = [0, 2, 2, 0], sizes = [1, 16, 16, 128], strides = [1, 1, 1, 1]} : vector<1x18x18x128xbf16> to vector<1x16x16x128xbf16>
    %20 = vector.shape_cast %19 : vector<1x16x16x128xbf16> to vector<256x128xbf16>
    %21 = tpu.concatenate %4, %6, %8, %10, %12, %14, %16, %18, %20 in 1 : vector<256x128xbf16>, vector<256x128xbf16>, vector<256x128xbf16>, vector<256x128xbf16>, vector<256x128xbf16>, vector<256x128xbf16>, vector<256x128xbf16>, vector<256x128xbf16>, vector<256x128xbf16> -> vector<256x1152xbf16>
    %cst = arith.constant dense<0.000000e+00> : vector<256x128xf32>
    %22 = tpu.matmul %21, %2, %cst {dimension_numbers = #tpu.dot_dimension_numbers<[1], [0], [0], [1], [0, 0, 1, 1], [], []>} : vector<256x1152xbf16>, vector<1152x128xbf16>, vector<256x128xf32> -> vector<256x128xf32>
    %c0_5 = arith.constant 0 : index
    %c0_6 = arith.constant 0 : index
    %23 = vector.load %arg3[%c0_5, %c0_6] : memref<1x128xf32, #tpu.memory_space<vmem>>, vector<1x128xf32>
    %24 = vector.broadcast %23 : vector<1x128xf32> to vector<256x128xf32>
    %25 = arith.addf %22, %24 : vector<256x128xf32>
    %cst_7 = arith.constant 0.000000e+00 : f32
    %26 = vector.broadcast %cst_7 : f32 to vector<256x128xf32>
    %27 = arith.maximumf %25, %26 : vector<256x128xf32>
    %cst_8 = arith.constant 0.000000e+00 : f32
    %28 = vector.broadcast %cst_8 : f32 to vector<1x18x18x128xf32>
    %c0_9 = arith.constant 0 : index
    %c0_10 = arith.constant 0 : index
    %c0_11 = arith.constant 0 : index
    %c0_12 = arith.constant 0 : index
    %29 = vector.load %arg4[%c0_9, %c0_10, %c0_11, %c0_12] : memref<1x18x18x128xf32, #tpu.memory_space<vmem>>, vector<1x18x18x128xf32>
    tpu.vector_store %arg4[%c0_9, %c0_10, %c0_11, %c0_12], %28 {strides = array<i32>} : memref<1x18x18x128xf32, #tpu.memory_space<vmem>>, vector<1x18x18x128xf32>,
    %30 = vector.shape_cast %27 : vector<256x128xf32> to vector<1x16x16x128xf32>
    %c0_13 = arith.constant 0 : index
    %c1 = arith.constant 1 : index
    %c1_14 = arith.constant 1 : index
    %c0_15 = arith.constant 0 : index
    %31 = vector.load %arg4[%c0_13, %c1, %c1_14, %c0_15] : memref<1x18x18x128xf32, #tpu.memory_space<vmem>>, vector<1x16x16x128xf32>
    tpu.vector_store %arg4[%c0_13, %c1, %c1_14, %c0_15], %30 {strides = array<i32>} : memref<1x18x18x128xf32, #tpu.memory_space<vmem>>, vector<1x16x16x128xf32>,
    return
  }
  func.func @transform_0(%arg0: i32) -> (i32, i32, i32, i32) {
    %c0_i32 = arith.constant 0 : i32
    %c0_i32_0 = arith.constant 0 : i32
    %c0_i32_1 = arith.constant 0 : i32
    %c0_i32_2 = arith.constant 0 : i32
    return %arg0, %c0_i32, %c0_i32_0, %c0_i32_1 : i32, i32, i32, i32
  }
  func.func @transform_1(%arg0: i32) -> (i32, i32) {
    %c0_i32 = arith.constant 0 : i32
    %c0_i32_0 = arith.constant 0 : i32
    %c0_i32_1 = arith.constant 0 : i32
    return %c0_i32, %c0_i32_0 : i32, i32
  }
  func.func @transform_2(%arg0: i32) -> (i32, i32) {
    %c0_i32 = arith.constant 0 : i32
    %c0_i32_0 = arith.constant 0 : i32
    %c0_i32_1 = arith.constant 0 : i32
    return %c0_i32, %c0_i32_0 : i32, i32
  }
  func.func @transform_3(%arg0: i32) -> (i32, i32, i32, i32) {
    %c0_i32 = arith.constant 0 : i32
    %c0_i32_0 = arith.constant 0 : i32
    %c0_i32_1 = arith.constant 0 : i32
    %c0_i32_2 = arith.constant 0 : i32
    return %arg0, %c0_i32, %c0_i32_0, %c0_i32_1 : i32, i32, i32, i32
  }
}

</mosaic_0001>

<bundles_post_ra>
// kernel: tpu_custom_call.1
= control target key start
LH: loop header
LB: loop body
LE: loop exit
PB: predicated region body
PF: predicated region fallthrough
CT: control target
= control target key end

     0   :  { %s2929_s12 = smov 0   ;;  %s4090_s0 = inlined_call_operand.vmem [shape: f32[2,18,18,128], index: 0, kind: input, shape index: {}]   ;;  %s4091_s1 = inlined_call_operand.vmem [shape: bf16[1152,128], index: 1, kind: input, shape index: {}]   ;;  %s4092_s2 = inlined_call_operand.vmem [shape: f32[1,128], index: 2, kind: input, shape index: {}]   ;;  %s4093_s3 = inlined_call_operand.vmem [shape: f32[2,18,18,128], index: 3, kind: output, shape index: {}]  }
   0x1 LB: > { %s2168_s13 = sadd.s32 4294967295, %s2906_s12   ;;  %p2172_p0 = scmp.ge.s32.totalorder %s2906_s12, 1  ;;  %s2906_s12 = sphi %s2929_s12, %s13_s12  }
   0x2   : > { %p137_p1 = scmp.lt.s32.totalorder %s2906_s12, 3 }
   0x4   : > { %p138_p2 = pnand %p2172_p0, %p137_p1 }
   0x5   : > { %v2828_v0 = vld [vmem:[%s4091_s1 + $0x40] sm:$0xff] (!%p138_p2)   ;;  %p161_p3 = scmp.lt.s32.totalorder (!%p138_p2), %s2168_s13, 1  ;;  %v2830_v2 = vld [vmem:[%s4091_s1 + $0x48] sm:$0xff] (!%p138_p2)   ;;  %v2832_v4 = vld [vmem:[%s4091_s1 + $0x50] sm:$0xff] (!%p138_p2)   ;;  %vm406_vm0 = vsmask.f32 (!%p138_p2), 7424 }
   0x6   : > { %141 = sbr.rel (%p138_p2) target bundleno = 542 (0x21e), region = 32  ;;  %v2829_v1 = vld [vmem:[%s4091_s1] sm:$0xff] (!%p138_p2)   ;;  %2282 = vmatprep.subr.bf16.mxu0 (!%p138_p2), %v2828_v0  ;;  %2802 = vmatprep.subr.bf16.mxu1 (!%p138_p2), %v2828_v0  ;;  %v2831_v3 = vld [vmem:[%s4091_s1 + $0x8] sm:$0xff] (!%p138_p2)   ;;  %v2833_v5 = vld [vmem:[%s4091_s1 + $0x10] sm:$0xff] (!%p138_p2)   ;;  %vm647_vm1 = vcmask (!%p138_p2), 1046528  }
   0x7   : > { %2283 = vmatpush3.bf16.msra.mxu0 (!%p138_p2), %v2829_v1  ;;  %2810 = vmatpush3.bf16.msra.mxu1 (!%p138_p2), %v2829_v1  ;;  %v2834_v6 = vld [vmem:[%s4091_s1 + $0x58] sm:$0xff] (!%p138_p2)   ;;  %v2836_v8 = vld [vmem:[%s4091_s1 + $0x60] sm:$0xff] (!%p138_p2)   ;;  %v2838_v10 = vld [vmem:[%s4091_s1 + $0x68] sm:$0xff] (!%p138_p2)  }
   0x8   : > { %2284 = vmatprep.subr.bf16.mxu0 (!%p138_p2), %v2830_v2  ;;  %2803 = vmatprep.subr.bf16.mxu1 (!%p138_p2), %v2830_v2  ;;  %v2835_v7 = vld [vmem:[%s4091_s1 + $0x18] sm:$0xff] (!%p138_p2)   ;;  %v2837_v9 = vld [vmem:[%s4091_s1 + $0x20] sm:$0xff] (!%p138_p2)   ;;  %v2839_v21 = vld [vmem:[%s4091_s1 + $0x28] sm:$0xff] (!%p138_p2)  }
   0x9   : > { %v2840_v25 = vld [vmem:[%s4091_s1 + $0x70] sm:$0xff] (!%p138_p2)   ;;  %v2842_v35 = vld [vmem:[%s4091_s1 + $0x78] sm:$0xff] (!%p138_p2)   ;;  %v2844_v49 = vld [vmem:[%s4091_s1 + $0xc0] sm:$0xff] (!%p138_p2)  }
   0xa   : > { %v2841_v29 = vld [vmem:[%s4091_s1 + $0x30] sm:$0xff] (!%p138_p2)   ;;  %v2843_v37 = vld [vmem:[%s4091_s1 + $0x38] sm:$0xff] (!%p138_p2)   ;;  %v2847_v50 = vld [vmem:[%s4091_s1 + $0x140] sm:$0xff] (!%p138_p2)  }
   0xb   : > { %2285 = vmatpush3.bf16.msra.mxu0 (!%p138_p2), %v2831_v3  ;;  %2811 = vmatpush3.bf16.msra.mxu1 (!%p138_p2), %v2831_v3  ;;  %v2845_v54 = vld [vmem:[%s4091_s1 + $0x80] sm:$0xff] (!%p138_p2)   ;;  %v2846_v63 = vld [vmem:[%s4091_s1 + $0xc8] sm:$0xff] (!%p138_p2)  }
   0xc   : > { %2286 = vmatprep.subr.bf16.mxu0 (!%p138_p2), %v2832_v4  ;;  %2804 = vmatprep.subr.bf16.mxu1 (!%p138_p2), %v2832_v4  ;;  %v2849_v55 = vld [vmem:[%s4091_s1 + $0x100] sm:$0xff] (!%p138_p2)  }
   0xd   : > { %s4095_s13 = smov (!%p161_p3, %s2168_s13), 1 }
   0xe   : > { %s2818_s28 = smul.u32 432, %s4095_s13 }
   0xf   : > { %2287 = vmatpush3.bf16.msra.mxu0 %v2833_v5  ;;  %2812 = vmatpush3.bf16.msra.mxu1 %v2833_v5 }
  0x10   : > { %2288 = vmatprep.subr.bf16.mxu0 %v2834_v6  ;;  %2805 = vmatprep.subr.bf16.mxu1 %v2834_v6  ;;  %s2972_s8 = scalar_lea.vmem %s4090_s0, %s2818_s28  ;;  %s3751_s25 = scalar_lea.vmem %s4093_s3, %s2818_s28 }
  0x11   : > { %v172_v11 = vld [vmem:[%s2972_s8] sm:$0xff]  ;;  %v173_v12 = vld [vmem:[%s2972_s8 + $0x8] sm:$0xff]  ;;  %v174_v13 = vld [vmem:[%s2972_s8 + $0x10] sm:$0x3] }
  0x12   : > { %v2983_v14 = vpack.c.bf16 %v173_v12, %v172_v11  ;;  %v2985_v15 = vpack.c.bf16 %v174_v13, %v174_v13  ;;  %v208_v16 = vld [vmem:[%s2972_s8 + $0x120] sm:$0xff]  ;;  %v209_v17 = vld [vmem:[%s2972_s8 + $0x128] sm:$0xff]  ;;  %v210_v18 = vld [vmem:[%s2972_s8 + $0x130] sm:$0x3] }
  0x13   : > { %2289 = vmatpush3.bf16.msra.mxu0 %v2835_v7  ;;  %2813 = vmatpush3.bf16.msra.mxu1 %v2835_v7  ;;  %v2990_v19 = vpack.c.bf16 %v209_v17, %v208_v16  ;;  %v2992_v20 = vpack.c.bf16 %v210_v18, %v210_v18  ;;  %v175_v39 = vld [vmem:[%s2972_s8 + $0x18] sm:$0xff]  ;;  %v176_v40 = vld [vmem:[%s2972_s8 + $0x20] sm:$0xff]  ;;  %v177_v42 = vld [vmem:[%s2972_s8 + $0x28] sm:$0x3] }
  0x14   : > { %2290 = vmatprep.subr.bf16.mxu0 %v2836_v8  ;;  %2806 = vmatprep.subr.bf16.mxu1 %v2836_v8  ;;  %v408_v22 = vshrl.u32 %v2983_v14, 16  ;;  %v410_v23 = vshll.u32 %v2983_v14, 16  ;;  %v415_v24 = vshll.u32 %v2985_v15, 16  ;;  %v3022_v43 = vpack.c.bf16 %v176_v40, %v175_v39  ;;  %v211_v44 = vld [vmem:[%s2972_s8 + $0x138] sm:$0xff]  ;;  %v212_v45 = vld [vmem:[%s2972_s8 + $0x140] sm:$0xff]  ;;  %v178_v2 = vld [vmem:[%s2972_s8 + $0x30] sm:$0xff] }
  0x15   : > { %v552_v26 = vshrl.u32 %v2990_v19, 16  ;;  %v554_v27 = vshll.u32 %v2990_v19, 16  ;;  %v559_v28 = vshll.u32 %v2992_v20, 16  ;;  %v3026_v46 = vpack.c.bf16 %v177_v42, %v177_v42  ;;  %v213_v47 = vld [vmem:[%s2972_s8 + $0x148] sm:$0x3]  ;;  %v179_v3 = vld [vmem:[%s2972_s8 + $0x38] sm:$0xff] }
  0x16   : > { %v412_v30 = vrot.slane %v410_v23, 1  ;;  %v417_v31 = vrot.slane %v415_v24, 1  ;;  %v3029_v48 = vpack.c.bf16 %v212_v45, %v211_v44  ;;  %v420_v51 = vshrl.u32 %v3022_v43, 16  ;;  %v180_v5 = vld [vmem:[%s2972_s8 + $0x40] sm:$0x3]  ;;  %v214_v7 = vld [vmem:[%s2972_s8 + $0x150] sm:$0xff] }
  0x17   : > { %2291 = vmatpush3.bf16.msra.mxu0 %v2837_v9  ;;  %2814 = vmatpush3.bf16.msra.mxu1 %v2837_v9  ;;  %v556_v32 = vrot.slane %v554_v27, 1  ;;  %v561_v33 = vrot.slane %v559_v28, 1  ;;  %v422_v52 = vshll.u32 %v3022_v43, 16  ;;  %v3039_v53 = vpack.c.bf16 %v213_v47, %v213_v47  ;;  %v215_v8 = vld [vmem:[%s2972_s8 + $0x158] sm:$0xff]  ;;  %v216_v11 = vld [vmem:[%s2972_s8 + $0x160] sm:$0x3] }
  0x18   : > { %2292 = vmatprep.subr.bf16.mxu0 %v2838_v10  ;;  %2807 = vmatprep.subr.bf16.mxu1 %v2838_v10  ;;  %v413_v34 = vor.u32 %v412_v30, %v408_v22  ;;  %v427_v56 = vshll.u32 %v3026_v46, 16  ;;  %v564_v57 = vshrl.u32 %v3029_v48, 16  ;;  %v566_v58 = vshll.u32 %v3029_v48, 16  ;;  %v2848_v13 = vld [vmem:[%s4091_s1 + $0x88] sm:$0xff]   ;;  %v2850_v23 = vld [vmem:[%s4091_s1 + $0xd0] sm:$0xff]  }
  0x19   : > { %v557_v36 = vor.u32 %v556_v32, %v552_v26  ;;  %v424_v59 = vrot.slane %v422_v52, 1  ;;  %v571_v60 = vshll.u32 %v3039_v53, 16  ;;  %v3058_v6 = vpack.c.bf16 %v179_v3, %v178_v2  ;;  %v2855_v22 = vld [vmem:[%s4091_s1 + $0x148] sm:$0xff]   ;;  %v2851_v27 = vld [vmem:[%s4091_s1 + $0x90] sm:$0xff]   ;;  %v183_v44 = vld [vmem:[%s2972_s8 + $0x58] sm:$0x3] }
  0x1a   : > { %v418_v38 = vsel %vm406_vm0, %v413_v34, %v417_v31  ;;  %v429_v61 = vrot.slane %v427_v56, 1  ;;  %v568_v62 = vrot.slane %v566_v58, 1  ;;  %v3067_v10 = vpack.c.bf16 %v180_v5, %v180_v5  ;;  %v2857_v34 = vld [vmem:[%s4091_s1 + $0x108] sm:$0xff]   ;;  %v182_v40 = vld [vmem:[%s2972_s8 + $0x50] sm:$0xff]  ;;  %v2856_v58 = vld [vmem:[%s4091_s1 + $0xa0] sm:$0xff]  }
  0x1b   : > { %2293 = vmatpush3.bf16.msra.mxu0 %v2839_v21  ;;  %2815 = vmatpush3.bf16.msra.mxu1 %v2839_v21  ;;  %v3019_v41 = vsel %vm406_vm0, %v557_v36, %v561_v33  ;;  %v425_v0 = vor.u32 %v424_v59, %v420_v51  ;;  %v573_v1 = vrot.slane %v571_v60, 1  ;;  %v3070_v12 = vpack.c.bf16 %v215_v8, %v214_v7  ;;  %v181_v39 = vld [vmem:[%s2972_s8 + $0x48] sm:$0xff]  ;;  %v219_v51 = vld [vmem:[%s2972_s8 + $0x178] sm:$0x3]  ;;  %v2863_v8 = vld [vmem:[%s4091_s1 + $0x150] sm:$0xff]  }
  0x1c   : > { %2294 = vmatprep.subr.bf16.mxu0 %v2840_v25  ;;  %2808 = vmatprep.subr.bf16.mxu1 %v2840_v25  ;;  %v569_v4 = vor.u32 %v568_v62, %v564_v57  ;;  %v432_v17 = vshrl.u32 %v3058_v6, 16  ;;  %v434_v18 = vshll.u32 %v3058_v6, 16  ;;  %v3080_v21 = vpack.c.bf16 %v216_v11, %v216_v11  ;;  %v217_v47 = vld [vmem:[%s2972_s8 + $0x168] sm:$0xff] }
  0x1d   : > { %1221 = vmatprep.mubr.bf16.mxu0 %v418_v38  ;;  %1317 = vmatprep.mubr.bf16.mxu1 %v3019_v41  ;;  %v3065_v9 = vsel %vm406_vm0, %v425_v0, %v429_v61  ;;  %v439_v24 = vshll.u32 %v3067_v10, 16  ;;  %v576_v25 = vshrl.u32 %v3070_v12, 16  ;;  %v578_v26 = vshll.u32 %v3070_v12, 16  ;;  %v2858_v2 = vld [vmem:[%s4091_s1 + $0xe8] sm:$0xff]  }
  0x1e   : > { %v3076_v16 = vsel %vm406_vm0, %v569_v4, %v573_v1  ;;  %v436_v28 = vrot.slane %v434_v18, 1  ;;  %v3117_v45 = vpack.c.bf16 %v182_v40, %v181_v39  ;;  %v3133_v57 = vpack.c.bf16 %v219_v51, %v219_v51  ;;  %v2859_v5 = vld [vmem:[%s4091_s1 + $0xa8] sm:$0xff]   ;;  %v2869_v40 = vld [vmem:[%s4091_s1 + $0x118] sm:$0xff]   ;;  %v190_v51 = vld [vmem:[%s2972_s8 + $0x90] sm:$0xff] }
  0x1f   : > { %2295 = vmatpush3.bf16.msra.mxu0 %v2841_v29  ;;  %2816 = vmatpush3.bf16.msra.mxu1 %v2841_v29  ;;  %v583_v29 = vshll.u32 %v3080_v21, 16  ;;  %v441_v30 = vrot.slane %v439_v24, 1  ;;  %v580_v31 = vrot.slane %v578_v26, 1  ;;  %v185_v18 = vld [vmem:[%s2972_s8 + $0x68] sm:$0xff] }
  0x20   : > { %2296 = vmatprep.subr.bf16.mxu0 %v2842_v35  ;;  %2809 = vmatprep.subr.bf16.mxu1 %v2842_v35  ;;  %v437_v32 = vor.u32 %v436_v28, %v432_v17  ;;  %v2852_v35 = vld [vmem:[%s4091_s1 + $0xd8] sm:$0xff]   ;;  %v446_v56 = vshll.u32 %v3117_v45, 16  ;;  %v184_v17 = vld [vmem:[%s2972_s8 + $0x60] sm:$0xff] }
  0x21   : > { %v585_v33 = vrot.slane %v583_v29, 1  ;;  %v581_v36 = vor.u32 %v580_v31, %v576_v25  ;;  %v3166_v24 = vpack.c.bf16 %v185_v18, %v184_v17  ;;  %v2860_v25 = vld [vmem:[%s4091_s1 + $0xf0] sm:$0xff]   ;;  %v188_v31 = vld [vmem:[%s2972_s8 + $0x80] sm:$0xff] }
  0x22   : > { %v3107_v38 = vsel %vm406_vm0, %v437_v32, %v441_v30  ;;  %v448_v62 = vrot.slane %v446_v56, 1  ;;  %v187_v30 = vld [vmem:[%s2972_s8 + $0x78] sm:$0xff]  ;;  %v2867_v17 = vld [vmem:[%s4091_s1 + $0x180] sm:$0xff]  }
  0x23   : > { %2297 = vmatpush3.bf16.msra.mxu0 %v2843_v37  ;;  %2817 = vmatpush3.bf16.msra.mxu1 %v2843_v37  ;;  %v2853_v37 = vld [vmem:[%s4091_s1 + $0x98] sm:$0xff]   ;;  %v3114_v42 = vsel %vm406_vm0, %v581_v36, %v585_v33  ;;  %v456_v28 = vshrl.u32 %v3166_v24, 16  ;;  %v458_v29 = vshll.u32 %v3166_v24, 16 }
  0x24   : > { %2394 = vmatprep.subr.bf16.mxu1 %v2844_v49  ;;  %2506 = vmatprep.subr.bf16.mxu0 %v2847_v50  ;;  %v218_v49 = vld [vmem:[%s2972_s8 + $0x170] sm:$0xff]  ;;  %v3122_v50 = vpack.c.bf16 %v183_v44, %v183_v44  ;;  %v2862_v32 = vld [vmem:[%s4091_s1 + $0xf8] sm:$0xff]  }
  0x25   : > { %v3125_v52 = vpack.c.bf16 %v218_v49, %v217_v47  ;;  %v2868_v36 = vld [vmem:[%s4091_s1 + $0x158] sm:$0xff]  }
  0x26   : > { %1222 = vmatmul.mubr.bf16.vlgmr.msra.gmra.mrb[0].mxu0 %v2983_v14  ;;  %1318 = vmatmul.mubr.bf16.vlgmr.msra.gmra.mrb[0].mxu1 %v2990_v19  ;;  %v451_v59 = vshll.u32 %v3122_v50, 16  ;;  %v191_v56 = vld [vmem:[%s2972_s8 + $0x98] sm:$0xff] }
  0x27   : > { %2395 = vmatpush3.bf16.msra.mxu1 %v2845_v54  ;;  %2507 = vmatpush3.bf16.msra.mxu0 %v2849_v55  ;;  %v2854_v54 = vld [vmem:[%s4091_s1 + $0xe0] sm:$0xff]   ;;  %v444_v55 = vshrl.u32 %v3117_v45, 16  ;;  %v588_v60 = vshrl.u32 %v3125_v52, 16  ;;  %v590_v61 = vshll.u32 %v3125_v52, 16 }
  0x28   : > { %2396 = vmatprep.subr.bf16.mxu1 %v2846_v63  ;;  %1229 = vmatprep.mubr.bf16.mxu0 %v3065_v9  ;;  %v595_v63 = vshll.u32 %v3133_v57, 16  ;;  %v453_v0 = vrot.slane %v451_v59, 1  ;;  %v649_v59 = vrot.slane %v2985_v15, 1  ;;  %v648_v15 = vrot.slane %v2983_v14, 1  ;;  %v2873_v14 = vld [vmem:[%s4091_s1 + $0x120] sm:$0xff]  }
  0x29   : > { %1325 = vmatprep.mubr.bf16.mxu1 %v3076_v16  ;;  %2508 = vmatprep.subr.bf16.mxu0 %v2855_v22  ;;  %v592_v1 = vrot.slane %v590_v61, 1  ;;  %v449_v3 = vor.u32 %v448_v62, %v444_v55  ;;  %v3205_v61 = vpack.c.bf16 %v191_v56, %v190_v51  ;;  %v2864_v62 = vld [vmem:[%s4091_s1 + $0xb8] sm:$0xff]   ;;  %v198_v51 = vld [vmem:[%s2972_s8 + $0xd0] sm:$0x3] }
  0x2a   : > { %v597_v4 = vrot.slane %v595_v63, 1  ;;  %v2878_v56 = vld [vmem:[%s4091_s1 + $0x170] sm:$0xff]  }
  0x2b   : > { %2397 = vmatpush3.bf16.msra.mxu1 %v2848_v13  ;;  %2509 = vmatpush3.bf16.msra.mxu0 %v2857_v34  ;;  %v593_v7 = vor.u32 %v592_v1, %v588_v60  ;;  %v3154_v11 = vsel %vm406_vm0, %v449_v3, %v453_v0  ;;  %v2865_v13 = vld [vmem:[%s4091_s1 + $0x110] sm:$0xff]   ;;  %v189_v34 = vld [vmem:[%s2972_s8 + $0x88] sm:$0x3]  ;;  %v2866_v1 = vld [vmem:[%s4091_s1 + $0x1c0] sm:$0xff]  }
  0x2c   : > { %2398 = vmatprep.subr.bf16.mxu1 %v2850_v23  ;;  %v186_v23 = vld [vmem:[%s2972_s8 + $0x70] sm:$0x3]  ;;  %2510 = vmatprep.subr.bf16.mxu0 %v2863_v8  ;;  %v3191_v39 = vpack.c.bf16 %v189_v34, %v189_v34  ;;  %v652_v34 = vrot.slane %v3026_v46, 1 }
  0x2d   : > { %v3163_v22 = vsel %vm406_vm0, %v593_v7, %v597_v4  ;;  %v3172_v26 = vpack.c.bf16 %v186_v23, %v186_v23  ;;  %v482_v4 = vshll.u32 %v3205_v61, 16  ;;  %v193_v7 = vld [vmem:[%s2972_s8 + $0xa8] sm:$0xff]  ;;  %v194_v8 = vld [vmem:[%s2972_s8 + $0xb0] sm:$0xff] }
  0x2e   : > { %1230 = vmatmul.mubr.bf16.gmra.mrb[4].mxu0 %v3022_v43  ;;  %1326 = vmatmul.mubr.bf16.gmra.mrb[4].mxu1 %v3029_v48  ;;  %v475_v55 = vshll.u32 %v3191_v39, 16  ;;  %v2870_v23 = vld [vmem:[%s4091_s1 + $0x1c8] sm:$0xff]   ;;  %v2875_v46 = vld [vmem:[%s4091_s1 + $0x1d0] sm:$0xff]  }
  0x2f   : > { %2399 = vmatpush3.bf16.msra.mxu1 %v2851_v27  ;;  %1237 = vmatprep.mubr.bf16.mxu0 %v3107_v38  ;;  %v2861_v27 = vld [vmem:[%s4091_s1 + $0xb0] sm:$0xff]   ;;  %v463_v33 = vshll.u32 %v3172_v26, 16 }
  0x30   : > { %2400 = vmatprep.subr.bf16.mxu1 %v2852_v35  ;;  %1333 = vmatprep.mubr.bf16.mxu1 %v3114_v42  ;;  %v3186_v35 = vpack.c.bf16 %v188_v31, %v187_v30  ;;  %v477_v3 = vrot.slane %v475_v55, 1  ;;  %v2871_v30 = vld [vmem:[%s4091_s1 + $0x188] sm:$0xff]   ;;  %v195_v31 = vld [vmem:[%s2972_s8 + $0xb8] sm:$0x3] }
  0x31   : > { %2511 = vmatpush3.bf16.msra.mxu0 %v2865_v13  ;;  %v465_v44 = vrot.slane %v463_v33, 1  ;;  %v650_v13 = vsel %vm647_vm1, %v648_v15, %v649_v59  ;;  %v651_v33 = vrot.slane %v3022_v43, 1  ;;  %v2877_v15 = vld [vmem:[%s4091_s1 + $0x190] sm:$0xff]  }
  0x32   : > { %v468_v47 = vshrl.u32 %v3186_v35, 16  ;;  %v470_v49 = vshll.u32 %v3186_v35, 16  ;;  %2512 = vmatprep.subr.bf16.mxu0 %v2868_v36  ;;  %v196_v36 = vld [vmem:[%s2972_s8 + $0xc0] sm:$0xff] }
  0x33   : > { %2401 = vmatpush3.bf16.msra.mxu1 %v2853_v37  ;;  %v460_v37 = vrot.slane %v458_v29, 1  ;;  %v3242_v29 = vpack.c.bf16 %v194_v8, %v193_v7  ;;  %v199_v7 = vld [vmem:[%s2972_s8 + $0xd8] sm:$0xff] }
  0x34   : > { %2402 = vmatprep.subr.bf16.mxu1 %v2854_v54  ;;  %v472_v60 = vrot.slane %v470_v49, 1  ;;  %v3261_v49 = vpack.c.bf16 %v195_v31, %v195_v31 }
  0x35   : > { %v461_v54 = vor.u32 %v460_v37, %v456_v28  ;;  %2513 = vmatpush3.bf16.msra.mxu0 %v2869_v40  ;;  %v484_v28 = vrot.slane %v482_v4, 1  ;;  %v2876_v37 = vld [vmem:[%s4091_s1 + $0x128] sm:$0xff]   ;;  %v492_v59 = vshrl.u32 %v3242_v29, 16  ;;  %v654_v4 = vrot.slane %v3058_v6, 1 }
  0x36   : > { %1238 = vmatmul.mubr.bf16.gmra.mrb[8].mxu0 %v3058_v6  ;;  %1334 = vmatmul.mubr.bf16.gmra.mrb[8].mxu1 %v3070_v12 }
  0x37   : > { %2403 = vmatpush3.bf16.msra.mxu1 %v2856_v58  ;;  %1245 = vmatprep.mubr.bf16.mxu0 %v3154_v11  ;;  %v192_v58 = vld [vmem:[%s2972_s8 + $0xa0] sm:$0x3]  ;;  %v3211_v63 = vsel %vm406_vm0, %v461_v54, %v465_v44  ;;  %v197_v44 = vld [vmem:[%s2972_s8 + $0xc8] sm:$0xff]  ;;  %v3269_v54 = vsel %vm647_vm1, %v651_v33, %v652_v34 }
  0x38   : > { %2404 = vmatprep.subr.bf16.mxu1 %v2858_v2  ;;  %1341 = vmatprep.mubr.bf16.mxu1 %v3163_v22  ;;  %v3215_v0 = vpack.c.bf16 %v192_v58, %v192_v58  ;;  %v473_v2 = vor.u32 %v472_v60, %v468_v47  ;;  %v3271_v55 = vpack.c.bf16 %v197_v44, %v196_v36  ;;  %v201_v33 = vld [vmem:[%s2972_s8 + $0xe8] sm:$0x3]  ;;  %v2885_v34 = vld [vmem:[%s4091_s1 + $0x1a0] sm:$0xff]   ;;  %v658_v44 = vrot.slane %v3122_v50, 1 }
  0x3a   : > { %v487_v18 = vshll.u32 %v3215_v0, 16 }
  0x3b   : > { %2405 = vmatpush3.bf16.msra.mxu1 %v2859_v5  ;;  %v2872_v5 = vld [vmem:[%s4091_s1 + $0x160] sm:$0xff]  }
  0x3c   : > { %2406 = vmatprep.subr.bf16.mxu1 %v2860_v25  ;;  %2514 = vmatprep.subr.bf16.mxu0 %v2872_v5  ;;  %v3239_v25 = vsel %vm406_vm0, %v473_v2, %v477_v3  ;;  %v489_v40 = vrot.slane %v487_v18, 1  ;;  %v2880_v2 = vld [vmem:[%s4091_s1 + $0x1d8] sm:$0xff]   ;;  %v3292_v3 = vpack.c.bf16 %v198_v51, %v198_v51  ;;  %v655_v5 = vrot.slane %v3067_v10, 1  ;;  %v2887_v51 = vld [vmem:[%s4091_s1 + $0x1e8] sm:$0xff]  }
  0x3d   : > { %2515 = vmatpush3.bf16.msra.mxu0 %v2873_v14  ;;  %v506_v14 = vshll.u32 %v3271_v55, 16  ;;  %v2881_v18 = vld [vmem:[%s4091_s1 + $0x198] sm:$0xff]   ;;  %v504_v10 = vshrl.u32 %v3271_v55, 16 }
  0x3e   : > { %1246 = vmatmul.mubr.bf16.gmra.mrb[12].mxu0 %v3117_v45  ;;  %1342 = vmatmul.mubr.bf16.gmra.mrb[12].mxu1 %v3125_v52  ;;  %v3316_v31 = vsel %vm647_vm1, %v654_v4, %v655_v5  ;;  %v204_v5 = vld [vmem:[%s2972_s8 + $0x100] sm:$0x3] }
  0x3f   : > { %2407 = vmatpush3.bf16.msra.mxu1 %v2861_v27  ;;  %1382 = vmatprep.mubr.bf16.mxu1 %v3022_v43  ;;  %v480_v27 = vshrl.u32 %v3205_v61, 16  ;;  %v494_v43 = vshll.u32 %v3242_v29, 16 }
  0x40   : > { %2408 = vmatprep.subr.bf16.mxu1 %v2862_v32  ;;  %1253 = vmatprep.mubr.bf16.mxu0 %v3211_v63  ;;  %v2874_v32 = vld [vmem:[%s4091_s1 + $0x168] sm:$0xff]  }
  0x41   : > { %v485_v47 = vor.u32 %v484_v28, %v480_v27  ;;  %2516 = vmatprep.subr.bf16.mxu0 %v2874_v32  ;;  %v496_v60 = vrot.slane %v494_v43, 1  ;;  %v511_v27 = vshll.u32 %v3292_v3, 16  ;;  %v2883_v28 = vld [vmem:[%s4091_s1 + $0x138] sm:$0xff]   ;;  %v508_v32 = vrot.slane %v506_v14, 1 }
  0x42   : > { %2517 = vmatpush3.bf16.msra.mxu0 %v2876_v37  ;;  %v3331_v43 = vpack.c.bf16 %v201_v33, %v201_v33  ;;  %v2894_v33 = vld [vmem:[%s4091_s1 + $0x1b8] sm:$0xff]  }
  0x43   : > { %2409 = vmatpush3.bf16.msra.mxu1 %v2864_v62  ;;  %v3277_v58 = vsel %vm406_vm0, %v485_v47, %v489_v40  ;;  %v499_v62 = vshll.u32 %v3261_v49, 16  ;;  %2518 = vmatprep.subr.bf16.mxu0 %v2878_v56  ;;  %v497_v8 = vor.u32 %v496_v60, %v492_v59  ;;  %v657_v40 = vrot.slane %v3117_v45, 1  ;;  %v202_v56 = vld [vmem:[%s2972_s8 + $0xf0] sm:$0xff]  ;;  %v2888_v60 = vld [vmem:[%s4091_s1 + $0x1a8] sm:$0xff]  }
  0x44   : > { %2618 = vmatprep.subr.bf16.mxu1 %v2866_v1  ;;  %v2879_v1 = vld [vmem:[%s4091_s1 + $0x130] sm:$0xff]   ;;  %v513_v47 = vrot.slane %v511_v27, 1  ;;  %v509_v59 = vor.u32 %v508_v32, %v504_v10  ;;  %v205_v27 = vld [vmem:[%s2972_s8 + $0x108] sm:$0xff] }
  0x45   : > { %v3356_v4 = vsel %vm647_vm1, %v657_v40, %v658_v44 }
  0x46   : > { %1254 = vmatmul.mubr.bf16.gmra.mrb[16].mxu0 %v3166_v24  ;;  %1383 = vmatmul.mubr.bf16.vlgmr.msra.gmra.mrb[16].mxu1 %v650_v13  ;;  %v501_v13 = vrot.slane %v499_v62, 1  ;;  %v3360_v14 = vsel %vm406_vm0, %v509_v59, %v513_v47  ;;  %v207_v59 = vld [vmem:[%s2972_s8 + $0x118] sm:$0x3] }
  0x47   : > { %2619 = vmatpush3.bf16.msra.mxu1 %v2867_v17  ;;  %1261 = vmatprep.mubr.bf16.mxu0 %v3239_v25  ;;  %v200_v17 = vld [vmem:[%s2972_s8 + $0xe0] sm:$0xff] }
  0x48   : > { %1390 = vmatprep.mubr.bf16.mxu1 %v3058_v6  ;;  %2620 = vmatprep.subr.bf16.mxu1 %v2870_v23  ;;  %v2882_v23 = vld [vmem:[%s4091_s1 + $0x178] sm:$0xff]   ;;  %v3323_v36 = vsel %vm406_vm0, %v497_v8, %v501_v13  ;;  %v3325_v37 = vpack.c.bf16 %v200_v17, %v199_v7  ;;  %v2891_v13 = vld [vmem:[%s4091_s1 + $0x1b0] sm:$0xff]  }
  0x49   : > { %2519 = vmatpush3.bf16.msra.mxu0 %v2879_v1  ;;  %v523_v1 = vshll.u32 %v3331_v43, 16  ;;  %v2893_v17 = vld [vmem:[%s4091_s1 + $0x1f8] sm:$0xff]  }
  0x4a   : > { %2520 = vmatprep.subr.bf16.mxu0 %v2882_v23  ;;  %v518_v50 = vshll.u32 %v3325_v37, 16  ;;  %v516_v62 = vshrl.u32 %v3325_v37, 16  ;;  %v661_v23 = vrot.slane %v3172_v26, 1 }
  0x4b   : > { %2621 = vmatpush3.bf16.msra.mxu1 %v2871_v30  ;;  %v2884_v30 = vld [vmem:[%s4091_s1 + $0x1e0] sm:$0xff]   ;;  %v525_v10 = vrot.slane %v523_v1, 1  ;;  %v3401_v1 = vpack.c.bf16 %v207_v59, %v207_v59  ;;  %v676_v59 = vrot.slane %v3331_v43, 1 }
  0x4c   : > { %2622 = vmatprep.subr.bf16.mxu1 %v2875_v46  ;;  %v3336_v46 = vld [vmem:[%s4091_s1 + $0x200] sm:$0xff]   ;;  %v520_v7 = vrot.slane %v518_v50, 1  ;;  %v663_v50 = vrot.slane %v3186_v35, 1 }
  0x4d   : > { %2521 = vmatpush3.bf16.msra.mxu0 %v2883_v28 }
  0x4e   : > { %1262 = vmatmul.mubr.bf16.gmra.mrb[20].mxu0 %v3186_v35  ;;  %1391 = vmatmul.mubr.bf16.gmra.mrb[20].mxu1 %v3269_v54  ;;  %v521_v28 = vor.u32 %v520_v7, %v516_v62 }
  0x4f   : > { %1269 = vmatprep.mubr.bf16.mxu0 %v3277_v58  ;;  %1398 = vmatprep.mubr.bf16.mxu1 %v3117_v45 }
  0x50   : > { %2623 = vmatpush3.bf16.msra.mxu1 %v2877_v15  ;;  %2754 = vmatprep.subr.bf16.mxu0 %v3336_v46  ;;  %v203_v15 = vld [vmem:[%s2972_s8 + $0xf8] sm:$0xff]  ;;  %v3389_v44 = vsel %vm406_vm0, %v521_v28, %v525_v10 }
  0x51   : > { %2624 = vmatprep.subr.bf16.mxu1 %v2880_v2  ;;  %v2890_v2 = vld [vmem:[%s4091_s1 + $0x1f0] sm:$0xff]   ;;  %v3362_v8 = vpack.c.bf16 %v203_v15, %v202_v56 }
  0x53   : > { %v530_v32 = vshll.u32 %v3362_v8, 16  ;;  %v528_v26 = vshrl.u32 %v3362_v8, 16  ;;  %v678_v43 = vrot.slane %v3362_v8, 1 }
  0x54   : > { %2625 = vmatpush3.bf16.msra.mxu1 %v2881_v18  ;;  %v660_v18 = vrot.slane %v3166_v24, 1 }
  0x55   : > { %2626 = vmatprep.subr.bf16.mxu1 %v2884_v30  ;;  %v3377_v30 = vpack.c.bf16 %v204_v5, %v204_v5  ;;  %v532_v47 = vrot.slane %v530_v32, 1 }
  0x56   : > { %1270 = vmatmul.mubr.bf16.gmra.mrb[24].mxu0 %v3205_v61  ;;  %1399 = vmatmul.mubr.bf16.gmra.mrb[24].mxu1 %v3316_v31  ;;  %v3385_v40 = vsel %vm647_vm1, %v660_v18, %v661_v23  ;;  %v547_v18 = vshll.u32 %v3401_v1, 16  ;;  %v667_v23 = vrot.slane %v3215_v0, 1  ;;  %v670_v0 = vrot.slane %v3261_v49, 1  ;;  %v2889_v49 = vld [vmem:[%s4091_s1 + $0x208] sm:$0xff]  }
  0x57   : > { %1277 = vmatprep.mubr.bf16.mxu0 %v3323_v36  ;;  %1406 = vmatprep.mubr.bf16.mxu1 %v3166_v24  ;;  %v533_v62 = vor.u32 %v532_v47, %v528_v26  ;;  %v672_v26 = vrot.slane %v3271_v55, 1  ;;  %v673_v47 = vrot.slane %v3292_v3, 1  ;;  %v2892_v3 = vld [vmem:[%s4091_s1 + $0x210] sm:$0xff]  }
  0x58   : > { %2627 = vmatpush3.bf16.msra.mxu1 %v2885_v34  ;;  %v206_v34 = vld [vmem:[%s2972_s8 + $0x110] sm:$0xff] }
  0x59   : > { %2628 = vmatprep.subr.bf16.mxu1 %v2887_v51  ;;  %v535_v51 = vshll.u32 %v3377_v30, 16  ;;  %v3392_v56 = vpack.c.bf16 %v206_v34, %v205_v27  ;;  %v549_v27 = vrot.slane %v547_v18, 1  ;;  %v2899_v18 = vld [vmem:[%s4091_s1 + $0x238] sm:$0xff]  }
  0x5b   : > { %v537_v15 = vrot.slane %v535_v51, 1  ;;  %v3440_v51 = vsel %vm647_vm1, %v672_v26, %v673_v47  ;;  %v220_v26 = vld [vmem:[%s2972_s8 + $0x180] sm:$0xff]  ;;  %v221_v47 = vld [vmem:[%s2972_s8 + $0x188] sm:$0xff] }
  0x5c   : > { %2629 = vmatpush3.bf16.msra.mxu1 %v2888_v60  ;;  %v664_v60 = vrot.slane %v3191_v39, 1  ;;  %v666_v39 = vrot.slane %v3205_v61, 1 }
  0x5d   : > { %2630 = vmatprep.subr.bf16.mxu1 %v2890_v2  ;;  %v542_v2 = vshll.u32 %v3392_v56, 16  ;;  %v3408_v7 = vsel %vm406_vm0, %v533_v62, %v537_v15  ;;  %v2897_v15 = vld [vmem:[%s4091_s1 + $0x228] sm:$0xff]  }
  0x5e   : > { %1278 = vmatmul.mubr.bf16.gmra.mrb[28].mxu0 %v3242_v29  ;;  %1407 = vmatmul.mubr.bf16.gmra.mrb[28].mxu1 %v3356_v4  ;;  %v3405_v5 = vsel %vm647_vm1, %v663_v50, %v664_v60  ;;  %v3419_v28 = vsel %vm647_vm1, %v666_v39, %v667_v23  ;;  %v2896_v60 = vld [vmem:[%s4091_s1 + $0x220] sm:$0xff]   ;;  %v685_v39 = vrot.slane %v2992_v20, 1  ;;  %v688_v20 = vrot.slane %v3039_v53, 1 }
  0x5f   : > { %1285 = vmatprep.mubr.bf16.mxu0 %v3360_v14  ;;  %1414 = vmatprep.mubr.bf16.mxu1 %v3186_v35  ;;  %v3520_v53 = vpack.c.bf16 %v221_v47, %v220_v26 }
  0x60   : > { %2631 = vmatpush3.bf16.msra.mxu1 %v2891_v13  ;;  %v540_v13 = vshrl.u32 %v3392_v56, 16 }
  0x61   : > { %2632 = vmatprep.subr.bf16.mxu1 %v2893_v17  ;;  %v544_v17 = vrot.slane %v542_v2, 1  ;;  %v682_v2 = vrot.slane %v3401_v1, 1  ;;  %v684_v1 = vrot.slane %v2990_v19, 1 }
  0x63   : > { %v545_v10 = vor.u32 %v544_v17, %v540_v13  ;;  %v2898_v13 = vld [vmem:[%s4091_s1 + $0x230] sm:$0xff]   ;;  %v3498_v23 = vsel %vm647_vm1, %v684_v1, %v685_v39 }
  0x64   : > { %2633 = vmatpush3.bf16.msra.mxu1 %v2894_v33  ;;  %v669_v33 = vrot.slane %v3242_v29, 1 }
  0x65   : > { %v3422_v32 = vsel %vm406_vm0, %v545_v10, %v549_v27  ;;  %v687_v10 = vrot.slane %v3029_v48, 1 }
  0x66   : > { %1286 = vmatmul.mubr.bf16.gmra.mrb[32].mxu0 %v3271_v55  ;;  %1415 = vmatmul.mubr.bf16.gmra.mrb[32].mxu1 %v3385_v40  ;;  %v3431_v34 = vsel %vm647_vm1, %v669_v33, %v670_v0  ;;  %v690_v33 = vrot.slane %v3070_v12, 1  ;;  %v691_v0 = vrot.slane %v3080_v21, 1 }
  0x67   : > { %1293 = vmatprep.mubr.bf16.mxu0 %v3389_v44  ;;  %1422 = vmatprep.mubr.bf16.mxu1 %v3205_v61  ;;  %v3507_v27 = vsel %vm647_vm1, %v687_v10, %v688_v20 }
  0x6e   : > { %1294 = vmatmul.mubr.bf16.gmra.mrb[36].mxu0 %v3325_v37  ;;  %1423 = vmatmul.mubr.bf16.gmra.mrb[36].mxu1 %v3405_v5 }
  0x6f   : > { %1301 = vmatprep.mubr.bf16.mxu0 %v3408_v7  ;;  %1430 = vmatprep.mubr.bf16.mxu1 %v3242_v29 }
  0x76   : > { %1302 = vmatmul.mubr.bf16.gmra.mrb[40].mxu0 %v3362_v8  ;;  %1431 = vmatmul.mubr.bf16.gmra.mrb[40].mxu1 %v3419_v28 }
  0x77   : > { %1309 = vmatprep.mubr.bf16.mxu0 %v3422_v32  ;;  %1438 = vmatprep.mubr.bf16.mxu1 %v3271_v55 }
  0x7e   : > { %1310 = vmatmul.mubr.bf16.gmra.mrb[44].mxu0 %v3392_v56  ;;  %1439 = vmatmul.mubr.bf16.gmra.mrb[44].mxu1 %v3431_v34 }
  0x7f   : > { %1446 = vmatprep.mubr.bf16.mxu1 %v3325_v37  ;;  %1543 = vmatprep.mubr.bf16.mxu0 %v3269_v54  ;;  %v675_v54 = vrot.slane %v3325_v37, 1 }
  0x81   : > { %v3456_v50 = vsel %vm647_vm1, %v675_v54, %v676_v59  ;;  %v693_v54 = vrot.slane %v3125_v52, 1  ;;  %v694_v59 = vrot.slane %v3133_v57, 1  ;;  %v727_v57 = vrot.slane %v3520_v53, 1 }
  0x83   : > { %v3529_v21 = vsel %vm647_vm1, %v693_v54, %v694_v59 }
  0x86   : > { %1447 = vmatmul.mubr.bf16.gmra.mrb[48].mxu1 %v3440_v51  ;;  %1544 = vmatmul.mubr.bf16.vlgmr.msra.gmra.mrb[48].mxu0 %v3065_v9  ;;  %v2895_v9 = vld [vmem:[%s4091_s1 + $0x218] sm:$0xff]  }
  0x87   : > { %2755 = vmatpush3.bf16.msra.mxu0 %v3336_v46  ;;  %1454 = vmatprep.mubr.bf16.mxu1 %v3362_v8  ;;  %v679_v46 = vrot.slane %v3377_v30, 1  ;;  %v681_v30 = vrot.slane %v3392_v56, 1 }
  0x88   : > { %1551 = vmatprep.mubr.bf16.mxu0 %v3316_v31  ;;  %2756 = vmatprep.subr.bf16.mxu0 %v2889_v49 }
  0x89   : > { %v3471_v62 = vsel %vm647_vm1, %v678_v43, %v679_v46  ;;  %v3486_v17 = vsel %vm647_vm1, %v681_v30, %v682_v2 }
  0x8b   : > { %2757 = vmatpush3.bf16.msra.mxu0 %v2889_v49  ;;  %v3518_v49 = vsel %vm647_vm1, %v690_v33, %v691_v0 }
  0x8c   : > { %2758 = vmatprep.subr.bf16.mxu0 %v2892_v3 }
  0x8e   : > { %1455 = vmatmul.mubr.bf16.gmra.mrb[52].mxu1 %v3456_v50  ;;  %1552 = vmatmul.mubr.bf16.gmra.mrb[52].mxu0 %v3107_v38 }
  0x8f   : > { %1462 = vmatprep.mubr.bf16.mxu1 %v3392_v56  ;;  %1559 = vmatprep.mubr.bf16.mxu0 %v3356_v4 }
  0x90   : > { %2759 = vmatpush3.bf16.msra.mxu0 %v2892_v3 }
  0x91   : > { %2760 = vmatprep.subr.bf16.mxu0 %v2895_v9 }
  0x94   : > { %2761 = vmatpush3.bf16.msra.mxu0 %v2895_v9 }
  0x95   : > { %2762 = vmatprep.subr.bf16.mxu0 %v2896_v60 }
  0x96   : > { %1463 = vmatmul.mubr.bf16.gmra.mrb[56].mxu1 %v3471_v62  ;;  %1560 = vmatmul.mubr.bf16.gmra.mrb[56].mxu0 %v3154_v11 }
  0x97   : > { %1470 = vmatprep.mubr.bf16.mxu1 %v2990_v19  ;;  %1567 = vmatprep.mubr.bf16.mxu0 %v3385_v40 }
  0x98   : > { %2763 = vmatpush3.bf16.msra.mxu0 %v2896_v60 }
  0x99   : > { %2764 = vmatprep.subr.bf16.mxu0 %v2897_v15 }
  0x9c   : > { %2765 = vmatpush3.bf16.msra.mxu0 %v2897_v15 }
  0x9d   : > { %2766 = vmatprep.subr.bf16.mxu0 %v2898_v13 }
  0x9e   : > { %1471 = vmatmul.mubr.bf16.gmra.mrb[60].mxu1 %v3486_v17  ;;  %1568 = vmatmul.mubr.bf16.gmra.mrb[60].mxu0 %v3211_v63 }
  0x9f   : > { %1478 = vmatprep.mubr.bf16.mxu1 %v3029_v48  ;;  %1575 = vmatprep.mubr.bf16.mxu0 %v3405_v5 }
  0xa0   : > { %2767 = vmatpush3.bf16.msra.mxu0 %v2898_v13 }
  0xa1   : > { %2768 = vmatprep.subr.bf16.mxu0 %v2899_v18 }
  0xa4   : > { %2769 = vmatpush3.bf16.msra.mxu0 %v2899_v18 }
  0xa6   : > { %1479 = vmatmul.mubr.bf16.gmra.mrb[64].mxu1 %v3498_v23  ;;  %1576 = vmatmul.mubr.bf16.gmra.mrb[64].mxu0 %v3239_v25 }
  0xa7   : > { %1486 = vmatprep.mubr.bf16.mxu1 %v3070_v12  ;;  %1583 = vmatprep.mubr.bf16.mxu0 %v3419_v28 }
  0xae   : > { %1487 = vmatmul.mubr.bf16.gmra.mrb[68].mxu1 %v3507_v27  ;;  %1584 = vmatmul.mubr.bf16.gmra.mrb[68].mxu0 %v3277_v58 }
  0xaf   : > { %1494 = vmatprep.mubr.bf16.mxu1 %v3125_v52  ;;  %1591 = vmatprep.mubr.bf16.mxu0 %v3431_v34 }
  0xb6   : > { %1495 = vmatmul.mubr.bf16.gmra.mrb[72].mxu1 %v3518_v49  ;;  %1592 = vmatmul.mubr.bf16.gmra.mrb[72].mxu0 %v3323_v36 }
  0xb7   : > { %1502 = vmatprep.mubr.bf16.mxu1 %v3520_v53  ;;  %1599 = vmatprep.mubr.bf16.mxu0 %v3440_v51 }
  0xbe   : > { %1503 = vmatmul.mubr.bf16.gmra.mrb[76].mxu1 %v3529_v21  ;;  %1600 = vmatmul.mubr.bf16.gmra.mrb[76].mxu0 %v3360_v14 }
  0xbf   : > { %1607 = vmatprep.mubr.bf16.mxu0 %v3456_v50  ;;  %1704 = vmatprep.mubr.bf16.mxu1 %v3107_v38 }
  0xc6   : > { %1608 = vmatmul.mubr.bf16.gmra.mrb[80].mxu0 %v3389_v44  ;;  %1705 = vmatmul.mubr.bf16.vlgmr.msra.gmra.mrb[80].mxu1 %v3058_v6  ;;  %v222_v6 = vld [vmem:[%s2972_s8 + $0x190] sm:$0x3] }
  0xc7   : > { %1615 = vmatprep.mubr.bf16.mxu0 %v3471_v62  ;;  %1712 = vmatprep.mubr.bf16.mxu1 %v3154_v11  ;;  %v259_v38 = vpack.c.bf16 %v222_v6, %v222_v6 }
  0xc9   : > { %v728_v11 = vrot.slane %v259_v38, 1 }
  0xce   : > { %1616 = vmatmul.mubr.bf16.gmra.mrb[84].mxu0 %v3408_v7  ;;  %1713 = vmatmul.mubr.bf16.gmra.mrb[84].mxu1 %v3117_v45  ;;  %v715_v45 = vshll.u32 %v3520_v53, 16 }
  0xcf   : > { %1623 = vmatprep.mubr.bf16.mxu0 %v3486_v17  ;;  %1720 = vmatprep.mubr.bf16.mxu1 %v3211_v63  ;;  %v3564_v63 = vsel %vm647_vm1, %v727_v57, %v728_v11 }
  0xd6   : > { %1624 = vmatmul.mubr.bf16.gmra.mrb[88].mxu0 %v3422_v32  ;;  %1721 = vmatmul.mubr.bf16.gmra.mrb[88].mxu1 %v3166_v24  ;;  %v713_v24 = vshrl.u32 %v3520_v53, 16 }
  0xd7   : > { %1631 = vmatprep.mubr.bf16.mxu0 %v3498_v23  ;;  %1728 = vmatprep.mubr.bf16.mxu1 %v3239_v25 }
  0xde   : > { %1632 = vmatmul.mubr.bf16.gmra.mrb[92].mxu0 %v3019_v41  ;;  %1729 = vmatmul.mubr.bf16.gmra.mrb[92].mxu1 %v3186_v35  ;;  %v717_v35 = vrot.slane %v715_v45, 1 }
  0xdf   : > { %1639 = vmatprep.mubr.bf16.mxu0 %v3507_v27  ;;  %1736 = vmatprep.mubr.bf16.mxu1 %v3277_v58 }
  0xe0   : > { %v718_v25 = vor.u32 %v717_v35, %v713_v24 }
  0xe6   : > { %1640 = vmatmul.mubr.bf16.gmra.mrb[96].mxu0 %v3076_v16  ;;  %1737 = vmatmul.mubr.bf16.gmra.mrb[96].mxu1 %v3205_v61  ;;  %v720_v61 = vshll.u32 %v259_v38, 16 }
  0xe7   : > { %1647 = vmatprep.mubr.bf16.mxu0 %v3518_v49  ;;  %1744 = vmatprep.mubr.bf16.mxu1 %v3323_v36 }
  0xee   : > { %1648 = vmatmul.mubr.bf16.gmra.mrb[100].mxu0 %v3114_v42  ;;  %1745 = vmatmul.mubr.bf16.gmra.mrb[100].mxu1 %v3242_v29  ;;  %v722_v29 = vrot.slane %v720_v61, 1 }
  0xef   : > { %1655 = vmatprep.mubr.bf16.mxu0 %v3529_v21  ;;  %1752 = vmatprep.mubr.bf16.mxu1 %v3360_v14 }
  0xf0   : > { %v3575_v15 = vsel %vm406_vm0, %v718_v25, %v722_v29 }
  0xf6   : > { %1656 = vmatmul.mubr.bf16.gmra.mrb[104].mxu0 %v3163_v22  ;;  %1753 = vmatmul.mubr.bf16.gmra.mrb[104].mxu1 %v3271_v55 }
  0xf7   : > { %1663 = vmatprep.mubr.bf16.mxu0 %v3564_v63  ;;  %1760 = vmatprep.mubr.bf16.mxu1 %v3389_v44 }
  0xf9   : > { %v2370_v58 = vpop.f32.mrb[0].mxu1  ;;  %v2298_v36 = vpop.f32.mrb[0].mxu0 }
  0xfa   : > { %v2371_v14 = vpop.f32.mrb[1].mxu1  ;;  %v2299_v3 = vpop.f32.mrb[1].mxu0 }
  0xfb   : > { %v3570_v9 = vadd.f32 %v2371_v14, %v2370_v58  ;;  %v2373_v43 = vpop.f32.mrb[2].mxu1  ;;  %v3572_v46 = vadd.f32 %v2299_v3, %v2298_v36  ;;  %v2301_v60 = vpop.f32.mrb[2].mxu0 }
  0xfc   : > { %v2374_v55 = vpop.f32.mrb[3].mxu1  ;;  %v2302_v30 = vpop.f32.mrb[3].mxu0 }
  0xfd   : > { %v3577_v2 = vadd.f32 %v2374_v55, %v2373_v43  ;;  %v3579_v44 = vadd.f32 %v2302_v30, %v2301_v60 }
  0xfe   : > { %1664 = vmatmul.mubr.bf16.gmra.mrb[108].mxu0 %v3575_v15  ;;  %1761 = vmatmul.mubr.bf16.gmra.mrb[108].mxu1 %v3325_v37 }
  0xff   : > { %1768 = vmatprep.mubr.bf16.mxu1 %v3408_v7  ;;  %2770 = vmatprep.mubr.bf16.mxu0 %v3316_v31 }
 0x101   : > { %v2376_v13 = vpop.f32.mrb[4].mxu1  ;;  %v2304_v18 = vpop.f32.mrb[4].mxu0 }
 0x102   : > { %v2377_v1 = vpop.f32.mrb[5].mxu1  ;;  %v2305_v39 = vpop.f32.mrb[5].mxu0 }
 0x103   : > { %v3585_v10 = vadd.f32 %v2377_v1, %v2376_v13  ;;  %v2379_v20 = vpop.f32.mrb[6].mxu1  ;;  %v3587_v33 = vadd.f32 %v2305_v39, %v2304_v18  ;;  %v2307_v0 = vpop.f32.mrb[6].mxu0 }
 0x104   : > { %v2380_v26 = vpop.f32.mrb[7].mxu1  ;;  %v2308_v47 = vpop.f32.mrb[7].mxu0 }
 0x105   : > { %v3589_v54 = vadd.f32 %v2380_v26, %v2379_v20  ;;  %v3591_v59 = vadd.f32 %v2308_v47, %v2307_v0 }
 0x106   : > { %1769 = vmatmul.mubr.bf16.gmra.mrb[112].mxu1 %v3362_v8  ;;  %2771 = vmatmul.mubr.bf16.vlgmr.msra.gmra.mrb[112].mxu0 %v3356_v4 }
 0x107   : > { %1776 = vmatprep.mubr.bf16.mxu1 %v3422_v32  ;;  %2774 = vmatprep.mubr.bf16.mxu0 %v3385_v40 }
 0x109   : > { %v2382_v31 = vpop.f32.mrb[8].mxu1  ;;  %v2310_v37 = vpop.f32.mrb[8].mxu0 }
 0x10a   : > { %v2383_v7 = vpop.f32.mrb[9].mxu1  ;;  %v2311_v6 = vpop.f32.mrb[9].mxu0 }
 0x10b   : > { %v3597_v38 = vadd.f32 %v2383_v7, %v2382_v31  ;;  %v2385_v45 = vpop.f32.mrb[10].mxu1  ;;  %v3599_v57 = vadd.f32 %v2311_v6, %v2310_v37  ;;  %v2313_v11 = vpop.f32.mrb[10].mxu0  ;;  %v223_v37 = vld [vmem:[%s2972_s8 + $0x198] sm:$0xff] }
 0x10c   : > { %v2386_v24 = vpop.f32.mrb[11].mxu1  ;;  %v2314_v35 = vpop.f32.mrb[11].mxu0 }
 0x10d   : > { %v3601_v61 = vadd.f32 %v2386_v24, %v2385_v45  ;;  %v3603_v8 = vadd.f32 %v2314_v35, %v2313_v11 }
 0x10e   : > { %1777 = vmatmul.mubr.bf16.gmra.mrb[116].mxu1 %v3392_v56  ;;  %2775 = vmatmul.mubr.bf16.gmra.mrb[116].mxu0 %v3405_v5 }
 0x10f   : > { %1784 = vmatprep.mubr.bf16.mxu1 %v3019_v41  ;;  %2778 = vmatprep.mubr.bf16.mxu0 %v3419_v28  ;;  %v3624_v28 = vld [vmem:[%s4092_s2] ss:$0 sm:$0xff] }
 0x110   : > { %v1224_v13 = vadd.f32 %v3572_v46, %v3624_v28  ;;  %v1227_v39 = vadd.f32 %v3579_v44, %v3624_v28  ;;  %v224_v44 = vld [vmem:[%s2972_s8 + $0x1a0] sm:$0xff]  ;;  %v1232_v45 = vadd.f32 %v3587_v33, %v3624_v28 }
 0x111   : > { %v2388_v4 = vpop.f32.mrb[12].mxu1  ;;  %v2316_v40 = vpop.f32.mrb[12].mxu0 }
 0x112   : > { %v2389_v32 = vpop.f32.mrb[13].mxu1  ;;  %v2317_v25 = vpop.f32.mrb[13].mxu0 }
 0x113   : > { %v3609_v29 = vadd.f32 %v2389_v32, %v2388_v4  ;;  %v2391_v58 = vpop.f32.mrb[14].mxu1  ;;  %v3611_v36 = vadd.f32 %v2317_v25, %v2316_v40  ;;  %v2319_v14 = vpop.f32.mrb[14].mxu0 }
 0x114   : > { %v2392_v3 = vpop.f32.mrb[15].mxu1  ;;  %v2320_v43 = vpop.f32.mrb[15].mxu0 }
 0x115   : > { %v3613_v60 = vadd.f32 %v2392_v3, %v2391_v58  ;;  %v3615_v56 = vadd.f32 %v2320_v43, %v2319_v14  ;;  %v225_v58 = vld [vmem:[%s2972_s8 + $0x1a8] sm:$0x3] }
 0x116   : > { %1785 = vmatmul.mubr.bf16.gmra.mrb[120].mxu1 %v2990_v19  ;;  %2779 = vmatmul.mubr.bf16.gmra.mrb[120].mxu0 %v3431_v34  ;;  %v261_v14 = vpack.c.bf16 %v225_v58, %v225_v58 }
 0x117   : > { %1792 = vmatprep.mubr.bf16.mxu1 %v3076_v16  ;;  %2782 = vmatprep.mubr.bf16.mxu0 %v3440_v51 }
 0x118   : > { %v747_v58 = vrot.slane %v261_v14, 1 }
 0x119   : > { %v2410_v41 = vpop.f32.mrb[16].mxu1  ;;  %v2322_v5 = vpop.f32.mrb[16].mxu0 }
 0x11a   : > { %v2411_v55 = vpop.f32.mrb[17].mxu1  ;;  %v2323_v30 = vpop.f32.mrb[17].mxu0 }
 0x11b   : > { %v2412_v18 = vadd.f32 %v2411_v55, %v2410_v41  ;;  %v2413_v19 = vpop.f32.mrb[18].mxu1  ;;  %v3628_v34 = vadd.f32 %v2323_v30, %v2322_v5  ;;  %v2325_v16 = vpop.f32.mrb[18].mxu0  ;;  %v1240_v55 = vadd.f32 %v3599_v57, %v3624_v28 }
 0x11c   : > { %v2414_v51 = vpop.f32.mrb[19].mxu1  ;;  %v2326_v1 = vpop.f32.mrb[19].mxu0 }
 0x11d   : > { %v3632_v20 = vadd.f32 %v2412_v18, %v1224_v13  ;;  %v2415_v0 = vadd.f32 %v2414_v51, %v2413_v19  ;;  %v3634_v26 = vadd.f32 %v2326_v1, %v2325_v16  ;;  %v739_v16 = vshll.u32 %v261_v14, 16 }
 0x11e   : > { %1793 = vmatmul.mubr.bf16.gmra.mrb[124].mxu1 %v3029_v48  ;;  %2783 = vmatmul.mubr.bf16.gmra.mrb[124].mxu0 %v3456_v50  ;;  %v1243_v51 = vadd.f32 %v3603_v8, %v3624_v28 }
 0x11f   : > { %v3638_v46 = vadd.f32 %v2415_v0, %v1227_v39  ;;  %1800 = vmatprep.mubr.bf16.mxu1 %v3114_v42  ;;  %2786 = vmatprep.mubr.bf16.mxu0 %v3471_v62  ;;  %v3648_v42 = vpack.c.bf16 %v224_v44, %v223_v37  ;;  %v1235_v62 = vadd.f32 %v3591_v59, %v3624_v28 }
 0x121   : > { %v2416_v47 = vpop.f32.mrb[20].mxu1  ;;  %v2328_v31 = vpop.f32.mrb[20].mxu0  ;;  %v734_v3 = vshll.u32 %v3648_v42, 16 }
 0x122   : > { %v2417_v7 = vpop.f32.mrb[21].mxu1  ;;  %v2329_v6 = vpop.f32.mrb[21].mxu0 }
 0x123   : > { %v2418_v11 = vadd.f32 %v2417_v7, %v2416_v47  ;;  %v2419_v48 = vpop.f32.mrb[22].mxu1  ;;  %v3646_v24 = vadd.f32 %v2329_v6, %v2328_v31  ;;  %v2331_v50 = vpop.f32.mrb[22].mxu0  ;;  %v741_v31 = vrot.slane %v739_v16, 1  ;;  %v1248_v6 = vadd.f32 %v3611_v36, %v3624_v28 }
 0x124   : > { %v2420_v35 = vpop.f32.mrb[23].mxu1  ;;  %v2332_v4 = vpop.f32.mrb[23].mxu0 }
 0x125   : > { %v3652_v40 = vadd.f32 %v2418_v11, %v1232_v45  ;;  %v2421_v32 = vadd.f32 %v2420_v35, %v2419_v48  ;;  %v3654_v25 = vadd.f32 %v2332_v4, %v2331_v50 }
 0x126   : > { %1801 = vmatmul.mubr.bf16.gmra.mrb[128].mxu1 %v3070_v12  ;;  %2787 = vmatmul.mubr.bf16.gmra.mrb[128].mxu0 %v3486_v17 }
 0x127   : > { %v3659_v33 = vadd.f32 %v2421_v32, %v1235_v62  ;;  %1808 = vmatprep.mubr.bf16.mxu1 %v3163_v22  ;;  %2790 = vmatprep.mubr.bf16.mxu0 %v3498_v23  ;;  %v732_v22 = vshrl.u32 %v3648_v42, 16  ;;  %v736_v23 = vrot.slane %v734_v3, 1  ;;  %v746_v32 = vrot.slane %v3648_v42, 1 }
 0x129   : > { %v2422_v59 = vpop.f32.mrb[24].mxu1  ;;  %v2334_v43 = vpop.f32.mrb[24].mxu0  ;;  %v737_v47 = vor.u32 %v736_v23, %v732_v22 }
 0x12a   : > { %v2423_v41 = vpop.f32.mrb[25].mxu1  ;;  %v2335_v5 = vpop.f32.mrb[25].mxu0 }
 0x12b   : > { %v2424_v30 = vadd.f32 %v2423_v41, %v2422_v59  ;;  %v2425_v12 = vpop.f32.mrb[26].mxu1  ;;  %v3666_v13 = vadd.f32 %v2335_v5, %v2334_v43  ;;  %v2337_v17 = vpop.f32.mrb[26].mxu0  ;;  %v1256_v41 = vadd.f32 %v3628_v34, %v3624_v28 }
 0x12c   : > { %v2426_v18 = vpop.f32.mrb[27].mxu1  ;;  %v2338_v19 = vpop.f32.mrb[27].mxu0 }
 0x12d   : > { %v3671_v1 = vadd.f32 %v2424_v30, %v1240_v55  ;;  %v2427_v39 = vadd.f32 %v2426_v18, %v2425_v12  ;;  %v3673_v0 = vadd.f32 %v2338_v19, %v2337_v17  ;;  %v748_v30 = vsel %vm647_vm1, %v746_v32, %v747_v58 }
 0x12e   : > { %1809 = vmatmul.mubr.bf16.gmra.mrb[132].mxu1 %v3125_v52  ;;  %2791 = vmatmul.mubr.bf16.gmra.mrb[132].mxu0 %v3507_v27 }
 0x12f   : > { %v3677_v57 = vadd.f32 %v2427_v39, %v1243_v51  ;;  %1816 = vmatprep.mubr.bf16.mxu1 %v3575_v15  ;;  %2794 = vmatprep.mubr.bf16.mxu0 %v3518_v49  ;;  %v742_v15 = vsel %vm406_vm0, %v737_v47, %v741_v31  ;;  %v1251_v49 = vadd.f32 %v3615_v56, %v3624_v28 }
 0x130   : > { %v1264_v39 = vadd.f32 %v3646_v24, %v3624_v28 }
 0x131   : > { %v2428_v37 = vpop.f32.mrb[28].mxu1  ;;  %v2340_v44 = vpop.f32.mrb[28].mxu0 }
 0x132   : > { %v2429_v8 = vpop.f32.mrb[29].mxu1  ;;  %v2341_v7 = vpop.f32.mrb[29].mxu0 }
 0x133   : > { %v2430_v45 = vadd.f32 %v2429_v8, %v2428_v37  ;;  %v2431_v11 = vpop.f32.mrb[30].mxu1  ;;  %v3683_v52 = vadd.f32 %v2341_v7, %v2340_v44  ;;  %v2343_v27 = vpop.f32.mrb[30].mxu0 }
 0x134   : > { %v2432_v48 = vpop.f32.mrb[31].mxu1  ;;  %v2344_v50 = vpop.f32.mrb[31].mxu0 }
 0x135   : > { %v3688_v35 = vadd.f32 %v2430_v45, %v1248_v6  ;;  %v2433_v4 = vadd.f32 %v2432_v48, %v2431_v11  ;;  %v3690_v62 = vadd.f32 %v2344_v50, %v2343_v27 }
 0x136   : > { %1817 = vmatmul.mubr.bf16.gmra.mrb[136].mxu1 %v3520_v53  ;;  %2795 = vmatmul.mubr.bf16.gmra.mrb[136].mxu0 %v3529_v21 }
 0x137   : > { %v3694_v36 = vadd.f32 %v2433_v4, %v1251_v49  ;;  %1824 = vmatprep.mubr.bf16.mxu1 %v742_v15  ;;  %2798 = vmatprep.mubr.bf16.mxu0 %v3564_v63  ;;  %v1259_v63 = vadd.f32 %v3634_v26, %v3624_v28  ;;  %v1272_v15 = vadd.f32 %v3666_v13, %v3624_v28 }
 0x139   : > { %v2434_v3 = vpop.f32.mrb[32].mxu1  ;;  %v2346_v59 = vpop.f32.mrb[32].mxu0 }
 0x13a   : > { %v2435_v56 = vpop.f32.mrb[33].mxu1  ;;  %v2347_v43 = vpop.f32.mrb[33].mxu0 }
 0x13b   : > { %v2436_v5 = vadd.f32 %v2435_v56, %v2434_v3  ;;  %v2437_v55 = vpop.f32.mrb[34].mxu1  ;;  %v3700_v53 = vadd.f32 %v2347_v43, %v2346_v59  ;;  %v2349_v21 = vpop.f32.mrb[34].mxu0  ;;  %v1275_v59 = vadd.f32 %v3673_v0, %v3624_v28 }
 0x13c   : > { %v2438_v12 = vpop.f32.mrb[35].mxu1  ;;  %v2350_v17 = vpop.f32.mrb[35].mxu0 }
 0x13d   : > { %v3705_v14 = vadd.f32 %v2436_v5, %v1256_v41  ;;  %v2439_v18 = vadd.f32 %v2438_v12, %v2437_v55  ;;  %v2351_v19 = vadd.f32 %v2350_v17, %v2349_v21  ;;  %v1280_v12 = vadd.f32 %v3683_v52, %v3624_v28 }
 0x13e   : > { %1825 = vmatmul.mubr.bf16.gmra.mrb[140].mxu1 %v3648_v42  ;;  %2799 = vmatmul.mubr.bf16.gmra.mrb[140].mxu0 %v748_v30  ;;  %v1267_v42 = vadd.f32 %v3654_v25, %v3624_v28 }
 0x13f   : > { %v3708_v34 = vadd.f32 %v2439_v18, %v1259_v63 }
 0x141   : > { %v2440_v22 = vpop.f32.mrb[36].mxu1  ;;  %v2352_v23 = vpop.f32.mrb[36].mxu0 }
 0x142   : > { %v2441_v16 = vpop.f32.mrb[37].mxu1  ;;  %v2353_v51 = vpop.f32.mrb[37].mxu0 }
 0x143   : > { %v2442_v47 = vadd.f32 %v2441_v16, %v2440_v22  ;;  %v2443_v31 = vpop.f32.mrb[38].mxu1  ;;  %v3712_v37 = vadd.f32 %v2353_v51, %v2352_v23  ;;  %v2355_v26 = vpop.f32.mrb[38].mxu0  ;;  %v1283_v16 = vadd.f32 %v3690_v62, %v3624_v28  ;;  %v1288_v62 = vadd.f32 %v3700_v53, %v3624_v28 }
 0x144   : > { %v2444_v44 = vpop.f32.mrb[39].mxu1  ;;  %v2356_v8 = vpop.f32.mrb[39].mxu0 }
 0x145   : > { %v3716_v7 = vadd.f32 %v2442_v47, %v1264_v39  ;;  %v2445_v6 = vadd.f32 %v2444_v44, %v2443_v31  ;;  %v3718_v45 = vadd.f32 %v2356_v8, %v2355_v26 }
 0x147   : > { %v3720_v11 = vadd.f32 %v2445_v6, %v1267_v42 }
 0x149   : > { %v2446_v27 = vpop.f32.mrb[40].mxu1  ;;  %v2358_v48 = vpop.f32.mrb[40].mxu0 }
 0x14a   : > { %v2447_v24 = vpop.f32.mrb[41].mxu1  ;;  %v2359_v50 = vpop.f32.mrb[41].mxu0 }
 0x14b   : > { %v2448_v49 = vadd.f32 %v2447_v24, %v2446_v27  ;;  %v2449_v4 = vpop.f32.mrb[42].mxu1  ;;  %v3724_v32 = vadd.f32 %v2359_v50, %v2358_v48  ;;  %v2361_v58 = vpop.f32.mrb[42].mxu0  ;;  %v1291_v24 = vadd.f32 %v2351_v19, %v3624_v28 }
 0x14c   : > { %v2450_v25 = vpop.f32.mrb[43].mxu1  ;;  %v2362_v3 = vpop.f32.mrb[43].mxu0 }
 0x14d   : > { %v3728_v56 = vadd.f32 %v2448_v49, %v1272_v15  ;;  %v2451_v43 = vadd.f32 %v2450_v25, %v2449_v4  ;;  %v3730_v41 = vadd.f32 %v2362_v3, %v2361_v58  ;;  %v2908_v25 = vmov 0.0  }
 0x14e   : > { %2032 = vst [vmem:[%s3751_s25 + $0x30] sm:$0xff] %v2908_v25  ;;  %2033 = vst [vmem:[%s3751_s25 + $0x38] sm:$0xff] %v2908_v25 }
 0x14f   : > { %v3732_v5 = vadd.f32 %v2451_v43, %v1275_v59  ;;  %2026 = vst [vmem:[%s3751_s25] sm:$0xff] %v2908_v25  ;;  %2027 = vst [vmem:[%s3751_s25 + $0x8] sm:$0xff] %v2908_v25 }
 0x150   : > { %2028 = vst [vmem:[%s3751_s25 + $0x10] sm:$0x3] %v2908_v25  ;;  %2029 = vst [vmem:[%s3751_s25 + $0x18] sm:$0xff] %v2908_v25 }
 0x151   : > { %v2452_v55 = vpop.f32.mrb[44].mxu1  ;;  %v2364_v21 = vpop.f32.mrb[44].mxu0  ;;  %2030 = vst [vmem:[%s3751_s25 + $0x20] sm:$0xff] %v2908_v25  ;;  %2031 = vst [vmem:[%s3751_s25 + $0x28] sm:$0x3] %v2908_v25 }
 0x152   : > { %v2453_v13 = vpop.f32.mrb[45].mxu1  ;;  %v2365_v30 = vpop.f32.mrb[45].mxu0  ;;  %2034 = vst [vmem:[%s3751_s25 + $0x40] sm:$0x3] %v2908_v25  ;;  %2035 = vst [vmem:[%s3751_s25 + $0x48] sm:$0xff] %v2908_v25 }
 0x153   : > { %v2454_v17 = vadd.f32 %v2453_v13, %v2452_v55  ;;  %v2455_v63 = vpop.f32.mrb[46].mxu1  ;;  %v3736_v18 = vadd.f32 %v2365_v30, %v2364_v21  ;;  %v2367_v0 = vpop.f32.mrb[46].mxu0  ;;  %2036 = vst [vmem:[%s3751_s25 + $0x50] sm:$0xff] %v2908_v25  ;;  %2037 = vst [vmem:[%s3751_s25 + $0x58] sm:$0x3] %v2908_v25  ;;  %v1296_v21 = vadd.f32 %v3712_v37, %v3624_v28 }
 0x154   : > { %v2456_v22 = vpop.f32.mrb[47].mxu1  ;;  %v2368_v23 = vpop.f32.mrb[47].mxu0  ;;  %2038 = vst [vmem:[%s3751_s25 + $0x60] sm:$0xff] %v2908_v25  ;;  %2039 = vst [vmem:[%s3751_s25 + $0x68] sm:$0xff] %v2908_v25 }
 0x155   : > { %v3740_v51 = vadd.f32 %v2454_v17, %v1280_v12  ;;  %v2457_v39 = vadd.f32 %v2456_v22, %v2455_v63  ;;  %v3742_v47 = vadd.f32 %v2368_v23, %v2367_v0  ;;  %2040 = vst [vmem:[%s3751_s25 + $0x70] sm:$0x3] %v2908_v25  ;;  %2041 = vst [vmem:[%s3751_s25 + $0x78] sm:$0xff] %v2908_v25 }
 0x156   : > { %2042 = vst [vmem:[%s3751_s25 + $0x80] sm:$0xff] %v2908_v25  ;;  %2043 = vst [vmem:[%s3751_s25 + $0x88] sm:$0x3] %v2908_v25  ;;  %v1299_v63 = vadd.f32 %v3718_v45, %v3624_v28  ;;  %v1304_v45 = vadd.f32 %v3724_v32, %v3624_v28 }
 0x157   : > { %v3744_v31 = vadd.f32 %v2457_v39, %v1283_v16  ;;  %2044 = vst [vmem:[%s3751_s25 + $0x90] sm:$0xff] %v2908_v25  ;;  %2045 = vst [vmem:[%s3751_s25 + $0x98] sm:$0xff] %v2908_v25 }
 0x158   : > { %2046 = vst [vmem:[%s3751_s25 + $0xa0] sm:$0x3] %v2908_v25  ;;  %2047 = vst [vmem:[%s3751_s25 + $0xa8] sm:$0xff] %v2908_v25 }
 0x159   : > { %v2458_v26 = vpop.f32.mrb[48].mxu1  ;;  %v2522_v44 = vpop.f32.mrb[48].mxu0  ;;  %2048 = vst [vmem:[%s3751_s25 + $0xb0] sm:$0xff] %v2908_v25  ;;  %2049 = vst [vmem:[%s3751_s25 + $0xb8] sm:$0x3] %v2908_v25 }
 0x15a   : > { %v2459_v52 = vpop.f32.mrb[49].mxu1  ;;  %v2523_v8 = vpop.f32.mrb[49].mxu0  ;;  %2050 = vst [vmem:[%s3751_s25 + $0xc0] sm:$0xff] %v2908_v25  ;;  %2051 = vst [vmem:[%s3751_s25 + $0xc8] sm:$0xff] %v2908_v25 }
 0x15b   : > { %v2460_v42 = vadd.f32 %v2459_v52, %v2458_v26  ;;  %v2524_v6 = vadd.f32 %v2523_v8, %v2522_v44  ;;  %v2461_v27 = vpop.f32.mrb[50].mxu1  ;;  %v2525_v48 = vpop.f32.mrb[50].mxu0  ;;  %2052 = vst [vmem:[%s3751_s25 + $0xd0] sm:$0x3] %v2908_v25  ;;  %2053 = vst [vmem:[%s3751_s25 + $0xd8] sm:$0xff] %v2908_v25 }
 0x15c   : > { %v2462_v50 = vpop.f32.mrb[51].mxu1  ;;  %v2526_v15 = vpop.f32.mrb[51].mxu0  ;;  %2054 = vst [vmem:[%s3751_s25 + $0xe0] sm:$0xff] %v2908_v25  ;;  %2055 = vst [vmem:[%s3751_s25 + $0xe8] sm:$0x3] %v2908_v25 }
 0x15d   : > { %v3756_v49 = vadd.f32 %v2460_v42, %v1288_v62  ;;  %v3759_v53 = vadd.f32 %v2524_v6, %v3632_v20  ;;  %v2463_v4 = vadd.f32 %v2462_v50, %v2461_v27  ;;  %v2527_v58 = vadd.f32 %v2526_v15, %v2525_v48  ;;  %2056 = vst [vmem:[%s3751_s25 + $0xf0] sm:$0xff] %v2908_v25 }
 0x15e   : > { %2057 = vst [vmem:[%s3751_s25 + $0xf8] sm:$0xff] %v2908_v25  ;;  %2058 = vst [vmem:[%s3751_s25 + $0x100] sm:$0x3] %v2908_v25 }
 0x15f   : > { %2059 = vst [vmem:[%s3751_s25 + $0x108] sm:$0xff] %v2908_v25  ;;  %2060 = vst [vmem:[%s3751_s25 + $0x110] sm:$0xff] %v2908_v25  ;;  %v3815_v20 = vadd.f32 %v2463_v4, %v1291_v24  ;;  %v3818_v19 = vadd.f32 %v2527_v58, %v3638_v46 }
 0x160   : > { %2061 = vst [vmem:[%s3751_s25 + $0x118] sm:$0x3] %v2908_v25  ;;  %2062 = vst [vmem:[%s3751_s25 + $0x120] sm:$0xff] %v2908_v25 }
 0x161   : > { %2063 = vst [vmem:[%s3751_s25 + $0x128] sm:$0xff] %v2908_v25  ;;  %2064 = vst [vmem:[%s3751_s25 + $0x130] sm:$0x3] %v2908_v25  ;;  %v2464_v3 = vpop.f32.mrb[52].mxu1  ;;  %v2528_v59 = vpop.f32.mrb[52].mxu0 }
 0x162   : > { %2065 = vst [vmem:[%s3751_s25 + $0x138] sm:$0xff] %v2908_v25  ;;  %2066 = vst [vmem:[%s3751_s25 + $0x140] sm:$0xff] %v2908_v25  ;;  %v2465_v43 = vpop.f32.mrb[53].mxu1  ;;  %v2529_v55 = vpop.f32.mrb[53].mxu0 }
 0x163   : > { %2067 = vst [vmem:[%s3751_s25 + $0x148] sm:$0x3] %v2908_v25  ;;  %2068 = vst [vmem:[%s3751_s25 + $0x150] sm:$0xff] %v2908_v25  ;;  %v2466_v13 = vadd.f32 %v2465_v43, %v2464_v3  ;;  %v2530_v30 = vadd.f32 %v2529_v55, %v2528_v59  ;;  %v2467_v12 = vpop.f32.mrb[54].mxu1  ;;  %v2531_v17 = vpop.f32.mrb[54].mxu0 }
 0x164   : > { %2069 = vst [vmem:[%s3751_s25 + $0x158] sm:$0xff] %v2908_v25  ;;  %2070 = vst [vmem:[%s3751_s25 + $0x160] sm:$0x3] %v2908_v25  ;;  %v2468_v0 = vpop.f32.mrb[55].mxu1  ;;  %v2532_v22 = vpop.f32.mrb[55].mxu0 }
 0x165   : > { %2071 = vst [vmem:[%s3751_s25 + $0x168] sm:$0xff] %v2908_v25  ;;  %2072 = vst [vmem:[%s3751_s25 + $0x170] sm:$0xff] %v2908_v25  ;;  %v3824_v23 = vadd.f32 %v2466_v13, %v1296_v21  ;;  %v3827_v46 = vadd.f32 %v2530_v30, %v3652_v40  ;;  %v2469_v16 = vadd.f32 %v2468_v0, %v2467_v12 }
 0x166   : > { %2073 = vst [vmem:[%s3751_s25 + $0x178] sm:$0x3] %v2908_v25  ;;  %2074 = vst [vmem:[%s3751_s25 + $0x180] sm:$0xff] %v2908_v25  ;;  %v2533_v39 = vadd.f32 %v2532_v22, %v2531_v17  ;;  %v1307_v40 = vadd.f32 %v3730_v41, %v3624_v28  ;;  %v1312_v41 = vadd.f32 %v3736_v18, %v3624_v28 }
 0x167   : > { %2075 = vst [vmem:[%s3751_s25 + $0x188] sm:$0xff] %v2908_v25  ;;  %2076 = vst [vmem:[%s3751_s25 + $0x190] sm:$0x3] %v2908_v25  ;;  %v3829_v26 = vadd.f32 %v2469_v16, %v1299_v63 }
 0x168   : > { %2077 = vst [vmem:[%s3751_s25 + $0x198] sm:$0xff] %v2908_v25  ;;  %2078 = vst [vmem:[%s3751_s25 + $0x1a0] sm:$0xff] %v2908_v25  ;;  %v3832_v37 = vadd.f32 %v2533_v39, %v3659_v33 }
 0x169   : > { %2079 = vst [vmem:[%s3751_s25 + $0x1a8] sm:$0x3] %v2908_v25  ;;  %v2470_v44 = vpop.f32.mrb[56].mxu1  ;;  %v2534_v52 = vpop.f32.mrb[56].mxu0 }
 0x16a   : > { %v2471_v8 = vpop.f32.mrb[57].mxu1  ;;  %v2535_v62 = vpop.f32.mrb[57].mxu0 }
 0x16b   : > { %v2472_v42 = vadd.f32 %v2471_v8, %v2470_v44  ;;  %v2536_v6 = vadd.f32 %v2535_v62, %v2534_v52  ;;  %v2473_v27 = vpop.f32.mrb[58].mxu1  ;;  %v2537_v48 = vpop.f32.mrb[58].mxu0 }
 0x16c   : > { %v2474_v24 = vpop.f32.mrb[59].mxu1  ;;  %v2538_v50 = vpop.f32.mrb[59].mxu0 }
 0x16d   : > { %v3838_v15 = vadd.f32 %v2472_v42, %v1304_v45  ;;  %v3841_v33 = vadd.f32 %v2536_v6, %v3671_v1  ;;  %v2475_v4 = vadd.f32 %v2474_v24, %v2473_v27  ;;  %v2539_v58 = vadd.f32 %v2538_v50, %v2537_v48 }
 0x16e   : > { %v1315_v1 = vadd.f32 %v3742_v47, %v3624_v28  ;;  %v1320_v47 = vadd.f32 %v3570_v9, %v3624_v28 }
 0x16f   : > { %v3843_v25 = vadd.f32 %v2475_v4, %v1307_v40  ;;  %v3846_v32 = vadd.f32 %v2539_v58, %v3677_v57 }
 0x171   : > { %v2476_v3 = vpop.f32.mrb[60].mxu1  ;;  %v2540_v59 = vpop.f32.mrb[60].mxu0 }
 0x172   : > { %v2477_v43 = vpop.f32.mrb[61].mxu1  ;;  %v2541_v55 = vpop.f32.mrb[61].mxu0 }
 0x173   : > { %v2478_v21 = vadd.f32 %v2477_v43, %v2476_v3  ;;  %v2542_v13 = vadd.f32 %v2541_v55, %v2540_v59  ;;  %v2479_v30 = vpop.f32.mrb[62].mxu1  ;;  %v2543_v12 = vpop.f32.mrb[62].mxu0 }
 0x174   : > { %v2480_v17 = vpop.f32.mrb[63].mxu1  ;;  %v2544_v63 = vpop.f32.mrb[63].mxu0 }
 0x175   : > { %v3852_v0 = vadd.f32 %v2478_v21, %v1312_v41  ;;  %v3855_v57 = vadd.f32 %v2542_v13, %v3688_v35  ;;  %v2481_v22 = vadd.f32 %v2480_v17, %v2479_v30  ;;  %v2545_v16 = vadd.f32 %v2544_v63, %v2543_v12 }
 0x176   : > { %v1323_v35 = vadd.f32 %v3577_v2, %v3624_v28  ;;  %v1328_v2 = vadd.f32 %v3585_v10, %v3624_v28 }
 0x177   : > { %v3857_v39 = vadd.f32 %v2481_v22, %v1315_v1  ;;  %v3860_v18 = vadd.f32 %v2545_v16, %v3694_v36 }
 0x179   : > { %v2482_v44 = vpop.f32.mrb[64].mxu1  ;;  %v2546_v52 = vpop.f32.mrb[64].mxu0 }
 0x17a   : > { %v2483_v8 = vpop.f32.mrb[65].mxu1  ;;  %v2547_v62 = vpop.f32.mrb[65].mxu0 }
 0x17b   : > { %v2484_v45 = vadd.f32 %v2483_v8, %v2482_v44  ;;  %v2548_v42 = vadd.f32 %v2547_v62, %v2546_v52  ;;  %v2485_v6 = vpop.f32.mrb[66].mxu1  ;;  %v2549_v27 = vpop.f32.mrb[66].mxu0 }
 0x17c   : > { %v2486_v48 = vpop.f32.mrb[67].mxu1  ;;  %v2550_v40 = vpop.f32.mrb[67].mxu0 }
 0x17d   : > { %v3866_v24 = vadd.f32 %v2484_v45, %v1320_v47  ;;  %v3869_v36 = vadd.f32 %v2548_v42, %v3705_v14  ;;  %v2487_v50 = vadd.f32 %v2486_v48, %v2485_v6  ;;  %v2551_v4 = vadd.f32 %v2550_v40, %v2549_v27 }
 0x17e   : > { %v1331_v14 = vadd.f32 %v3589_v54, %v3624_v28  ;;  %v1336_v54 = vadd.f32 %v3597_v38, %v3624_v28 }
 0x17f   : > { %v3871_v58 = vadd.f32 %v2487_v50, %v1323_v35  ;;  %v3874_v9 = vadd.f32 %v2551_v4, %v3708_v34 }
 0x181   : > { %v2488_v3 = vpop.f32.mrb[68].mxu1  ;;  %v2552_v59 = vpop.f32.mrb[68].mxu0 }
 0x182   : > { %v2489_v43 = vpop.f32.mrb[69].mxu1  ;;  %v2553_v55 = vpop.f32.mrb[69].mxu0 }
 0x183   : > { %v2490_v41 = vadd.f32 %v2489_v43, %v2488_v3  ;;  %v2554_v21 = vadd.f32 %v2553_v55, %v2552_v59  ;;  %v2491_v13 = vpop.f32.mrb[70].mxu1  ;;  %v2555_v30 = vpop.f32.mrb[70].mxu0 }
 0x184   : > { %v2492_v12 = vpop.f32.mrb[71].mxu1  ;;  %v2556_v1 = vpop.f32.mrb[71].mxu0 }
 0x185   : > { %v3880_v17 = vadd.f32 %v2490_v41, %v1328_v2  ;;  %v3883_v34 = vadd.f32 %v2554_v21, %v3716_v7  ;;  %v2493_v63 = vadd.f32 %v2492_v12, %v2491_v13  ;;  %v2557_v22 = vadd.f32 %v2556_v1, %v2555_v30 }
 0x186   : > { %v1339_v7 = vadd.f32 %v3601_v61, %v3624_v28  ;;  %v1344_v61 = vadd.f32 %v3609_v29, %v3624_v28 }
 0x187   : > { %v3885_v16 = vadd.f32 %v2493_v63, %v1331_v14  ;;  %v3888_v10 = vadd.f32 %v2557_v22, %v3720_v11 }
 0x189   : > { %v2494_v44 = vpop.f32.mrb[72].mxu1  ;;  %v2558_v52 = vpop.f32.mrb[72].mxu0 }
 0x18a   : > { %v2495_v8 = vpop.f32.mrb[73].mxu1  ;;  %v2559_v62 = vpop.f32.mrb[73].mxu0 }
 0x18b   : > { %v2496_v47 = vadd.f32 %v2495_v8, %v2494_v44  ;;  %v2560_v45 = vadd.f32 %v2559_v62, %v2558_v52  ;;  %v2497_v42 = vpop.f32.mrb[74].mxu1  ;;  %v2561_v6 = vpop.f32.mrb[74].mxu0 }
 0x18c   : > { %v2498_v27 = vpop.f32.mrb[75].mxu1  ;;  %v2562_v35 = vpop.f32.mrb[75].mxu0 }
 0x18d   : > { %v3894_v48 = vadd.f32 %v2496_v47, %v1336_v54  ;;  %v3897_v11 = vadd.f32 %v2560_v45, %v3728_v56  ;;  %v2499_v40 = vadd.f32 %v2498_v27, %v2497_v42  ;;  %v2563_v50 = vadd.f32 %v2562_v35, %v2561_v6 }
 0x18e   : > { %v1347_v56 = vadd.f32 %v3613_v60, %v3624_v28 }
 0x18f   : > { %v3899_v4 = vadd.f32 %v2499_v40, %v1339_v7  ;;  %v3902_v38 = vadd.f32 %v2563_v50, %v3732_v5 }
 0x191   : > { %v2500_v3 = vpop.f32.mrb[76].mxu1  ;;  %v2564_v59 = vpop.f32.mrb[76].mxu0 }
 0x192   : > { %v2501_v43 = vpop.f32.mrb[77].mxu1  ;;  %v2565_v55 = vpop.f32.mrb[77].mxu0 }
 0x193   : > { %v2502_v2 = vadd.f32 %v2501_v43, %v2500_v3  ;;  %v2566_v41 = vadd.f32 %v2565_v55, %v2564_v59  ;;  %v2503_v21 = vpop.f32.mrb[78].mxu1  ;;  %v2567_v13 = vpop.f32.mrb[78].mxu0 }
 0x194   : > { %v2504_v30 = vpop.f32.mrb[79].mxu1  ;;  %v2568_v14 = vpop.f32.mrb[79].mxu0 }
 0x195   : > { %v3908_v12 = vadd.f32 %v2502_v2, %v1344_v61  ;;  %v3911_v5 = vadd.f32 %v2566_v41, %v3740_v51  ;;  %v2505_v1 = vadd.f32 %v2504_v30, %v2503_v21  ;;  %v2569_v63 = vadd.f32 %v2568_v14, %v2567_v13 }
 0x197   : > { %v3913_v22 = vadd.f32 %v2505_v1, %v1347_v56  ;;  %v3916_v29 = vadd.f32 %v2569_v63, %v3744_v31 }
 0x199   : > { %v2570_v44 = vpop.f32.mrb[80].mxu0  ;;  %v2634_v52 = vpop.f32.mrb[80].mxu1 }
 0x19a   : > { %v2571_v8 = vpop.f32.mrb[81].mxu0  ;;  %v2635_v62 = vpop.f32.mrb[81].mxu1 }
 0x19b   : > { %v2572_v54 = vadd.f32 %v2571_v8, %v2570_v44  ;;  %v2636_v60 = vadd.f32 %v2635_v62, %v2634_v52  ;;  %v2573_v28 = vpop.f32.mrb[82].mxu0  ;;  %v2637_v47 = vpop.f32.mrb[82].mxu1 }
 0x19c   : > { %v2574_v45 = vpop.f32.mrb[83].mxu0  ;;  %v2638_v42 = vpop.f32.mrb[83].mxu1 }
 0x19d   : > { %v3919_v51 = vadd.f32 %v2572_v54, %v3756_v49  ;;  %v2575_v6 = vadd.f32 %v2574_v45, %v2573_v28  ;;  %v2639_v7 = vadd.f32 %v2638_v42, %v2637_v47  ;;  %v3922_v27 = vadd.f32 %v2636_v60, %v3759_v53 }
 0x19f   : > { %v3925_v31 = vadd.f32 %v2575_v6, %v3815_v20  ;;  %v3928_v35 = vadd.f32 %v2639_v7, %v3818_v19 }
 0x1a1   : > { %v2576_v40 = vpop.f32.mrb[84].mxu0  ;;  %v2640_v50 = vpop.f32.mrb[84].mxu1 }
 0x1a2   : > { %v2577_v3 = vpop.f32.mrb[85].mxu0  ;;  %v2641_v59 = vpop.f32.mrb[85].mxu1 }
 0x1a3   : > { %v2578_v43 = vadd.f32 %v2577_v3, %v2576_v40  ;;  %v2642_v55 = vadd.f32 %v2641_v59, %v2640_v50  ;;  %v2579_v61 = vpop.f32.mrb[86].mxu0  ;;  %v2643_v49 = vpop.f32.mrb[86].mxu1 }
 0x1a4   : > { %v2580_v2 = vpop.f32.mrb[87].mxu0  ;;  %v2644_v41 = vpop.f32.mrb[87].mxu1 }
 0x1a5   : > { %v3931_v21 = vadd.f32 %v2578_v43, %v3824_v23  ;;  %v2581_v53 = vadd.f32 %v2580_v2, %v2579_v61  ;;  %v2645_v13 = vadd.f32 %v2644_v41, %v2643_v49  ;;  %v3934_v20 = vadd.f32 %v2642_v55, %v3827_v46 }
 0x1a7   : > { %v3937_v19 = vadd.f32 %v2581_v53, %v3829_v26  ;;  %v3940_v56 = vadd.f32 %v2645_v13, %v3832_v37 }
 0x1a9   : > { %v2582_v30 = vpop.f32.mrb[88].mxu0  ;;  %v2646_v14 = vpop.f32.mrb[88].mxu1 }
 0x1aa   : > { %v2583_v1 = vpop.f32.mrb[89].mxu0  ;;  %v2647_v63 = vpop.f32.mrb[89].mxu1 }
 0x1ab   : > { %v2584_v44 = vadd.f32 %v2583_v1, %v2582_v30  ;;  %v2648_v52 = vadd.f32 %v2647_v63, %v2646_v14  ;;  %v2585_v8 = vpop.f32.mrb[90].mxu0  ;;  %v2649_v23 = vpop.f32.mrb[90].mxu1 }
 0x1ac   : > { %v2586_v62 = vpop.f32.mrb[91].mxu0  ;;  %v2650_v54 = vpop.f32.mrb[91].mxu1 }
 0x1ad   : > { %v3943_v60 = vadd.f32 %v2584_v44, %v3838_v15  ;;  %v2587_v46 = vadd.f32 %v2586_v62, %v2585_v8  ;;  %v2651_v28 = vadd.f32 %v2650_v54, %v2649_v23  ;;  %v3946_v26 = vadd.f32 %v2648_v52, %v3841_v33 }
 0x1af   : > { %v3949_v37 = vadd.f32 %v2587_v46, %v3843_v25  ;;  %v3952_v47 = vadd.f32 %v2651_v28, %v3846_v32 }
 0x1b1   : > { %v2588_v45 = vpop.f32.mrb[92].mxu0  ;;  %v2652_v42 = vpop.f32.mrb[92].mxu1 }
 0x1b2   : > { %v2589_v6 = vpop.f32.mrb[93].mxu0  ;;  %v2653_v7 = vpop.f32.mrb[93].mxu1 }
 0x1b3   : > { %v2590_v40 = vadd.f32 %v2589_v6, %v2588_v45  ;;  %v2654_v50 = vadd.f32 %v2653_v7, %v2652_v42  ;;  %v2591_v3 = vpop.f32.mrb[94].mxu0  ;;  %v2655_v15 = vpop.f32.mrb[94].mxu1 }
 0x1b4   : > { %v2592_v59 = vpop.f32.mrb[95].mxu0  ;;  %v2656_v43 = vpop.f32.mrb[95].mxu1 }
 0x1b5   : > { %v3955_v55 = vadd.f32 %v2590_v40, %v3852_v0  ;;  %v2593_v33 = vadd.f32 %v2592_v59, %v2591_v3  ;;  %v2657_v61 = vadd.f32 %v2656_v43, %v2655_v15  ;;  %v3958_v25 = vadd.f32 %v2654_v50, %v3855_v57 }
 0x1b7   : > { %v3961_v32 = vadd.f32 %v2593_v33, %v3857_v39  ;;  %v3964_v49 = vadd.f32 %v2657_v61, %v3860_v18 }
 0x1b9   : > { %v2594_v2 = vpop.f32.mrb[96].mxu0  ;;  %v2658_v41 = vpop.f32.mrb[96].mxu1 }
 0x1ba   : > { %v2595_v53 = vpop.f32.mrb[97].mxu0  ;;  %v2659_v13 = vpop.f32.mrb[97].mxu1 }
 0x1bb   : > { %v2596_v30 = vadd.f32 %v2595_v53, %v2594_v2  ;;  %v2660_v14 = vadd.f32 %v2659_v13, %v2658_v41  ;;  %v2597_v1 = vpop.f32.mrb[98].mxu0  ;;  %v2661_v0 = vpop.f32.mrb[98].mxu1 }
 0x1bc   : > { %v2598_v63 = vpop.f32.mrb[99].mxu0  ;;  %v2662_v44 = vpop.f32.mrb[99].mxu1 }
 0x1bd   : > { %v3967_v52 = vadd.f32 %v2596_v30, %v3866_v24  ;;  %v2599_v57 = vadd.f32 %v2598_v63, %v2597_v1  ;;  %v2663_v8 = vadd.f32 %v2662_v44, %v2661_v0  ;;  %v3970_v39 = vadd.f32 %v2660_v14, %v3869_v36 }
 0x1bf   : > { %v3973_v18 = vadd.f32 %v2599_v57, %v3871_v58  ;;  %v3976_v23 = vadd.f32 %v2663_v8, %v3874_v9 }
 0x1c1   : > { %v2600_v62 = vpop.f32.mrb[100].mxu0  ;;  %v2664_v54 = vpop.f32.mrb[100].mxu1 }
 0x1c2   : > { %v2601_v46 = vpop.f32.mrb[101].mxu0  ;;  %v2665_v28 = vpop.f32.mrb[101].mxu1 }
 0x1c3   : > { %v2602_v45 = vadd.f32 %v2601_v46, %v2600_v62  ;;  %v2666_v42 = vadd.f32 %v2665_v28, %v2664_v54  ;;  %v2603_v6 = vpop.f32.mrb[102].mxu0  ;;  %v2667_v24 = vpop.f32.mrb[102].mxu1 }
 0x1c4   : > { %v2604_v7 = vpop.f32.mrb[103].mxu0  ;;  %v2668_v40 = vpop.f32.mrb[103].mxu1 }
 0x1c5   : > { %v3979_v50 = vadd.f32 %v2602_v45, %v3880_v17  ;;  %v2605_v36 = vadd.f32 %v2604_v7, %v2603_v6  ;;  %v2669_v3 = vadd.f32 %v2668_v40, %v2667_v24  ;;  %v3982_v58 = vadd.f32 %v2666_v42, %v3883_v34 }
 0x1c7   : > { %v3985_v9 = vadd.f32 %v2605_v36, %v3885_v16  ;;  %v3988_v15 = vadd.f32 %v2669_v3, %v3888_v10 }
 0x1c9   : > { %v2606_v59 = vpop.f32.mrb[104].mxu0  ;;  %v2670_v43 = vpop.f32.mrb[104].mxu1 }
 0x1ca   : > { %v2607_v33 = vpop.f32.mrb[105].mxu0  ;;  %v2671_v61 = vpop.f32.mrb[105].mxu1 }
 0x1cb   : > { %v2608_v2 = vadd.f32 %v2607_v33, %v2606_v59  ;;  %v2672_v41 = vadd.f32 %v2671_v61, %v2670_v43  ;;  %v2609_v53 = vpop.f32.mrb[106].mxu0  ;;  %v2673_v17 = vpop.f32.mrb[106].mxu1 }
 0x1cc   : > { %v2610_v13 = vpop.f32.mrb[107].mxu0  ;;  %v2674_v30 = vpop.f32.mrb[107].mxu1 }
 0x1cd   : > { %v3991_v14 = vadd.f32 %v2608_v2, %v3894_v48  ;;  %v2611_v34 = vadd.f32 %v2610_v13, %v2609_v53  ;;  %v2675_v1 = vadd.f32 %v2674_v30, %v2673_v17  ;;  %v3994_v16 = vadd.f32 %v2672_v41, %v3897_v11 }
 0x1cf   : > { %v3997_v10 = vadd.f32 %v2611_v34, %v3899_v4  ;;  %v4000_v0 = vadd.f32 %v2675_v1, %v3902_v38 }
 0x1d1   : > { %v2612_v63 = vpop.f32.mrb[108].mxu0  ;;  %v2676_v44 = vpop.f32.mrb[108].mxu1 }
 0x1d2   : > { %v2613_v57 = vpop.f32.mrb[109].mxu0  ;;  %v2677_v8 = vpop.f32.mrb[109].mxu1 }
 0x1d3   : > { %v2614_v62 = vadd.f32 %v2613_v57, %v2612_v63  ;;  %v2678_v54 = vadd.f32 %v2677_v8, %v2676_v44  ;;  %v2615_v46 = vpop.f32.mrb[110].mxu0  ;;  %v2679_v48 = vpop.f32.mrb[110].mxu1 }
 0x1d4   : > { %v2616_v28 = vpop.f32.mrb[111].mxu0  ;;  %v2680_v45 = vpop.f32.mrb[111].mxu1 }
 0x1d5   : > { %v4003_v42 = vadd.f32 %v2614_v62, %v3908_v12  ;;  %v2617_v11 = vadd.f32 %v2616_v28, %v2615_v46  ;;  %v2681_v6 = vadd.f32 %v2680_v45, %v2679_v48  ;;  %v4006_v4 = vadd.f32 %v2678_v54, %v3911_v5 }
 0x1d7   : > { %v4009_v38 = vadd.f32 %v2617_v11, %v3913_v22  ;;  %v4012_v24 = vadd.f32 %v2681_v6, %v3916_v29 }
 0x1d9   : > { %v2682_v7 = vpop.f32.mrb[112].mxu1  ;;  %v2772_v40 = vpop.f32.mrb[112].mxu0 }
 0x1da   : > { %v1876_v36 = vadd.f32 %v2772_v40, %v3934_v20  ;;  %v2683_v3 = vpop.f32.mrb[113].mxu1  ;;  %v1867_v12 = vpop.f32.mrb[113].mxu0 }
 0x1db   : > { %v2684_v59 = vadd.f32 %v2683_v3, %v2682_v7  ;;  %v1868_v43 = vadd.f32 %v1867_v12, %v3922_v27  ;;  %v2685_v5 = vpop.f32.mrb[114].mxu1  ;;  %v2773_v33 = vpop.f32.mrb[114].mxu0 }
 0x1dc   : > { %v1996_v22 = vmax.f32 %v1876_v36, 0.0  ;;  %v1879_v61 = vadd.f32 %v2773_v33, %v3940_v56  ;;  %v2686_v29 = vpop.f32.mrb[115].mxu1  ;;  %v1870_v2 = vpop.f32.mrb[115].mxu0 }
 0x1dd   : > { %v1994_v41 = vmax.f32 %v1868_v43, 0.0  ;;  %v2687_v53 = vadd.f32 %v2686_v29, %v2685_v5  ;;  %v1871_v17 = vadd.f32 %v1870_v2, %v3928_v35  ;;  %v4019_v20 = vadd.f32 %v2684_v59, %v3919_v51 }
 0x1de   : > { %2250 = vst [vmem:[%s3751_s25 + $0x31] sm:$0xff] %v1996_v22  ;;  %v1997_v13 = vmax.f32 %v1879_v61, 0.0 }
 0x1df   : > { %2248 = vst [vmem:[%s3751_s25 + $0x19] sm:$0xff] %v1994_v41  ;;  %v1995_v27 = vmax.f32 %v1871_v17, 0.0  ;;  %v4024_v30 = vadd.f32 %v2687_v53, %v3925_v31 }
 0x1e0   : > { %2251 = vst [vmem:[%s3751_s25 + $0x39] sm:$0xff] %v1997_v13 }
 0x1e1   : > { %2249 = vst [vmem:[%s3751_s25 + $0x21] sm:$0xff] %v1995_v27  ;;  %v2688_v34 = vpop.f32.mrb[116].mxu1  ;;  %v2776_v56 = vpop.f32.mrb[116].mxu0 }
 0x1e2   : > { %v1892_v1 = vadd.f32 %v2776_v56, %v3958_v25  ;;  %v2689_v63 = vpop.f32.mrb[117].mxu1  ;;  %v1883_v35 = vpop.f32.mrb[117].mxu0 }
 0x1e3   : > { %v2690_v44 = vadd.f32 %v2689_v63, %v2688_v34  ;;  %v1884_v51 = vadd.f32 %v1883_v35, %v3946_v26  ;;  %v2691_v57 = vpop.f32.mrb[118].mxu1  ;;  %v2777_v8 = vpop.f32.mrb[118].mxu0 }
 0x1e4   : > { %v2000_v62 = vmax.f32 %v1892_v1, 0.0  ;;  %v1895_v31 = vadd.f32 %v2777_v8, %v3964_v49  ;;  %v2692_v54 = vpop.f32.mrb[119].mxu1  ;;  %v1886_v46 = vpop.f32.mrb[119].mxu0 }
 0x1e5   : > { %v1998_v48 = vmax.f32 %v1884_v51, 0.0  ;;  %v2693_v28 = vadd.f32 %v2692_v54, %v2691_v57  ;;  %v1887_v45 = vadd.f32 %v1886_v46, %v3952_v47  ;;  %v1779_v25 = vadd.f32 %v2690_v44, %v3931_v21 }
 0x1e6   : > { %2254 = vst [vmem:[%s3751_s25 + $0x61] sm:$0xff] %v2000_v62  ;;  %v2001_v11 = vmax.f32 %v1895_v31, 0.0 }
 0x1e7   : > { %2252 = vst [vmem:[%s3751_s25 + $0x49] sm:$0xff] %v1998_v48  ;;  %v1999_v6 = vmax.f32 %v1887_v45, 0.0  ;;  %v1782_v26 = vadd.f32 %v2693_v28, %v3937_v19 }
 0x1e8   : > { %2255 = vst [vmem:[%s3751_s25 + $0x69] sm:$0xff] %v2001_v11 }
 0x1e9   : > { %2253 = vst [vmem:[%s3751_s25 + $0x51] sm:$0xff] %v1999_v6  ;;  %v2694_v7 = vpop.f32.mrb[120].mxu1  ;;  %v2780_v40 = vpop.f32.mrb[120].mxu0 }
 0x1ea   : > { %v1908_v49 = vadd.f32 %v2780_v40, %v3982_v58  ;;  %v2695_v36 = vpop.f32.mrb[121].mxu1  ;;  %v1899_v3 = vpop.f32.mrb[121].mxu0 }
 0x1eb   : > { %v2696_v12 = vadd.f32 %v2695_v36, %v2694_v7  ;;  %v1900_v47 = vadd.f32 %v1899_v3, %v3970_v39  ;;  %v2697_v21 = vpop.f32.mrb[122].mxu1  ;;  %v2781_v59 = vpop.f32.mrb[122].mxu0 }
 0x1ec   : > { %v2004_v43 = vmax.f32 %v1908_v49, 0.0  ;;  %v1911_v19 = vadd.f32 %v2781_v59, %v3988_v15  ;;  %v2698_v5 = vpop.f32.mrb[123].mxu1  ;;  %v1902_v33 = vpop.f32.mrb[123].mxu0 }
 0x1ed   : > { %v2002_v22 = vmax.f32 %v1900_v47, 0.0  ;;  %v2699_v61 = vadd.f32 %v2698_v5, %v2697_v21  ;;  %v1903_v29 = vadd.f32 %v1902_v33, %v3976_v23  ;;  %v1787_v58 = vadd.f32 %v2696_v12, %v3943_v60 }
 0x1ee   : > { %2258 = vst [vmem:[%s3751_s25 + $0x91] sm:$0xff] %v2004_v43  ;;  %v2005_v2 = vmax.f32 %v1911_v19, 0.0 }
 0x1ef   : > { %2256 = vst [vmem:[%s3751_s25 + $0x79] sm:$0xff] %v2002_v22  ;;  %v2003_v41 = vmax.f32 %v1903_v29, 0.0  ;;  %v4046_v39 = vadd.f32 %v2699_v61, %v3949_v37 }
 0x1f0   : > { %2259 = vst [vmem:[%s3751_s25 + $0x99] sm:$0xff] %v2005_v2 }
 0x1f1   : > { %2257 = vst [vmem:[%s3751_s25 + $0x81] sm:$0xff] %v2003_v41  ;;  %v2700_v53 = vpop.f32.mrb[124].mxu1  ;;  %v2784_v17 = vpop.f32.mrb[124].mxu0 }
 0x1f2   : > { %v1924_v15 = vadd.f32 %v2784_v17, %v4006_v4  ;;  %v2701_v13 = vpop.f32.mrb[125].mxu1  ;;  %v1915_v27 = vpop.f32.mrb[125].mxu0 }
 0x1f3   : > { %v2702_v23 = vadd.f32 %v2701_v13, %v2700_v53  ;;  %v1916_v60 = vadd.f32 %v1915_v27, %v3994_v16  ;;  %v2703_v34 = vpop.f32.mrb[126].mxu1  ;;  %v2785_v56 = vpop.f32.mrb[126].mxu0 }
 0x1f4   : > { %v2008_v1 = vmax.f32 %v1924_v15, 0.0  ;;  %v1927_v37 = vadd.f32 %v2785_v56, %v4012_v24  ;;  %v2704_v63 = vpop.f32.mrb[127].mxu1  ;;  %v1918_v35 = vpop.f32.mrb[127].mxu0 }
 0x1f5   : > { %v2006_v44 = vmax.f32 %v1916_v60, 0.0  ;;  %v2705_v51 = vadd.f32 %v2704_v63, %v2703_v34  ;;  %v1919_v57 = vadd.f32 %v1918_v35, %v4000_v0  ;;  %v1795_v4 = vadd.f32 %v2702_v23, %v3955_v55 }
 0x1f6   : > { %2262 = vst [vmem:[%s3751_s25 + $0xc1] sm:$0xff] %v2008_v1  ;;  %v2009_v8 = vmax.f32 %v1927_v37, 0.0 }
 0x1f7   : > { %2260 = vst [vmem:[%s3751_s25 + $0xa9] sm:$0xff] %v2006_v44  ;;  %v2007_v62 = vmax.f32 %v1919_v57, 0.0  ;;  %v1798_v16 = vadd.f32 %v2705_v51, %v3961_v32 }
 0x1f8   : > { %2263 = vst [vmem:[%s3751_s25 + $0xc9] sm:$0xff] %v2009_v8 }
 0x1f9   : > { %2261 = vst [vmem:[%s3751_s25 + $0xb1] sm:$0xff] %v2007_v62  ;;  %v2706_v31 = vpop.f32.mrb[128].mxu1  ;;  %v2788_v54 = vpop.f32.mrb[128].mxu0 }
 0x1fa   : > { %v1940_v24 = vadd.f32 %v2788_v54, %v1779_v25  ;;  %v2707_v46 = vpop.f32.mrb[129].mxu1  ;;  %v1931_v48 = vpop.f32.mrb[129].mxu0 }
 0x1fb   : > { %v2708_v28 = vadd.f32 %v2707_v46, %v2706_v31  ;;  %v1932_v0 = vadd.f32 %v1931_v48, %v4019_v20  ;;  %v2709_v55 = vpop.f32.mrb[130].mxu1  ;;  %v2789_v45 = vpop.f32.mrb[130].mxu0 }
 0x1fc   : > { %v2012_v11 = vmax.f32 %v1940_v24, 0.0  ;;  %v1943_v6 = vadd.f32 %v2789_v45, %v1782_v26  ;;  %v2710_v7 = vpop.f32.mrb[131].mxu1  ;;  %v1934_v32 = vpop.f32.mrb[131].mxu0 }
 0x1fd   : > { %v2010_v40 = vmax.f32 %v1932_v0, 0.0  ;;  %v2711_v49 = vadd.f32 %v2710_v7, %v2709_v55  ;;  %v1935_v36 = vadd.f32 %v1934_v32, %v4024_v30  ;;  %v1803_v25 = vadd.f32 %v2708_v28, %v3967_v52 }
 0x1fe   : > { %2266 = vst [vmem:[%s3751_s25 + $0xf1] sm:$0xff] %v2012_v11  ;;  %v2013_v3 = vmax.f32 %v1943_v6, 0.0 }
 0x1ff   : > { %2264 = vst [vmem:[%s3751_s25 + $0xd9] sm:$0xff] %v2010_v40  ;;  %v2011_v12 = vmax.f32 %v1935_v36, 0.0  ;;  %v1806_v20 = vadd.f32 %v2711_v49, %v3973_v18 }
 0x200   : > { %2267 = vst [vmem:[%s3751_s25 + $0xf9] sm:$0xff] %v2013_v3 }
 0x201   : > { %2265 = vst [vmem:[%s3751_s25 + $0xe1] sm:$0xff] %v2011_v12  ;;  %v2712_v47 = vpop.f32.mrb[132].mxu1  ;;  %v2792_v21 = vpop.f32.mrb[132].mxu0 }
 0x202   : > { %v1956_v26 = vadd.f32 %v2792_v21, %v1795_v4  ;;  %v2713_v59 = vpop.f32.mrb[133].mxu1  ;;  %v1947_v43 = vpop.f32.mrb[133].mxu0 }
 0x203   : > { %v2714_v19 = vadd.f32 %v2713_v59, %v2712_v47  ;;  %v1948_v5 = vadd.f32 %v1947_v43, %v1787_v58  ;;  %v2715_v30 = vpop.f32.mrb[134].mxu1  ;;  %v2793_v52 = vpop.f32.mrb[134].mxu0 }
 0x204   : > { %v2016_v33 = vmax.f32 %v1956_v26, 0.0  ;;  %v1959_v22 = vadd.f32 %v2793_v52, %v1798_v16  ;;  %v2716_v61 = vpop.f32.mrb[135].mxu1  ;;  %v1950_v29 = vpop.f32.mrb[135].mxu0 }
 0x205   : > { %v2014_v18 = vmax.f32 %v1948_v5, 0.0  ;;  %v2717_v2 = vadd.f32 %v2716_v61, %v2715_v30  ;;  %v1951_v41 = vadd.f32 %v1950_v29, %v4046_v39  ;;  %v1811_v53 = vadd.f32 %v2714_v19, %v3979_v50 }
 0x206   : > { %2270 = vst [vmem:[%s3751_s25 + $0x121] sm:$0xff] %v2016_v33  ;;  %v2017_v17 = vmax.f32 %v1959_v22, 0.0 }
 0x207   : > { %2268 = vst [vmem:[%s3751_s25 + $0x109] sm:$0xff] %v2014_v18  ;;  %v2015_v15 = vmax.f32 %v1951_v41, 0.0  ;;  %v1814_v58 = vadd.f32 %v2717_v2, %v3985_v9 }
 0x208   : > { %2271 = vst [vmem:[%s3751_s25 + $0x129] sm:$0xff] %v2017_v17 }
 0x209   : > { %2269 = vst [vmem:[%s3751_s25 + $0x111] sm:$0xff] %v2015_v15  ;;  %v2718_v13 = vpop.f32.mrb[136].mxu1  ;;  %v2796_v27 = vpop.f32.mrb[136].mxu0 }
 0x20a   : > { %v1972_v23 = vadd.f32 %v2796_v27, %v1811_v53  ;;  %v2719_v60 = vpop.f32.mrb[137].mxu1  ;;  %v1963_v34 = vpop.f32.mrb[137].mxu0 }
 0x20b   : > { %v2720_v56 = vadd.f32 %v2719_v60, %v2718_v13  ;;  %v1964_v1 = vadd.f32 %v1963_v34, %v1803_v25  ;;  %v2721_v39 = vpop.f32.mrb[138].mxu1  ;;  %v2797_v50 = vpop.f32.mrb[138].mxu0 }
 0x20c   : > { %v2020_v37 = vmax.f32 %v1972_v23, 0.0  ;;  %v1975_v63 = vadd.f32 %v2797_v50, %v1814_v58  ;;  %v2722_v35 = vpop.f32.mrb[139].mxu1  ;;  %v1966_v44 = vpop.f32.mrb[139].mxu0 }
 0x20d   : > { %v2018_v9 = vmax.f32 %v1964_v1, 0.0  ;;  %v2723_v51 = vadd.f32 %v2722_v35, %v2721_v39  ;;  %v1967_v57 = vadd.f32 %v1966_v44, %v1806_v20  ;;  %v1819_v4 = vadd.f32 %v2720_v56, %v3991_v14 }
 0x20e   : > { %2274 = vst [vmem:[%s3751_s25 + $0x151] sm:$0xff] %v2020_v37  ;;  %v2021_v8 = vmax.f32 %v1975_v63, 0.0 }
 0x20f   : > { %2272 = vst [vmem:[%s3751_s25 + $0x139] sm:$0xff] %v2018_v9  ;;  %v2019_v62 = vmax.f32 %v1967_v57, 0.0  ;;  %v1822_v16 = vadd.f32 %v2723_v51, %v3997_v10 }
 0x210   : > { %2275 = vst [vmem:[%s3751_s25 + $0x159] sm:$0xff] %v2021_v8 }
 0x211   : > { %2273 = vst [vmem:[%s3751_s25 + $0x141] sm:$0xff] %v2019_v62  ;;  %v2724_v31 = vpop.f32.mrb[140].mxu1  ;;  %v2800_v54 = vpop.f32.mrb[140].mxu0 }
 0x212   : > { %v2725_v24 = vpop.f32.mrb[141].mxu1  ;;  %v1979_v46 = vpop.f32.mrb[141].mxu0 }
 0x213   : > { %v2726_v48 = vadd.f32 %v2725_v24, %v2724_v31  ;;  %v1980_v28 = vadd.f32 %v1979_v46, %v1819_v4  ;;  %v2727_v0 = vpop.f32.mrb[142].mxu1  ;;  %v2801_v55 = vpop.f32.mrb[142].mxu0 }
 0x214   : > { %v2728_v14 = vpop.f32.mrb[143].mxu1  ;;  %v1982_v45 = vpop.f32.mrb[143].mxu0 }
 0x215   : > { %v1827_v11 = vadd.f32 %v2726_v48, %v4003_v42  ;;  %v2022_v6 = vmax.f32 %v1980_v28, 0.0  ;;  %v2729_v10 = vadd.f32 %v2728_v14, %v2727_v0  ;;  %v1983_v7 = vadd.f32 %v1982_v45, %v1822_v16 }
 0x217   : > { %v1988_v32 = vadd.f32 %v2800_v54, %v1827_v11  ;;  %2276 = vst [vmem:[%s3751_s25 + $0x169] sm:$0xff] %v2022_v6  ;;  %v1830_v40 = vadd.f32 %v2729_v10, %v4009_v38  ;;  %v2023_v49 = vmax.f32 %v1983_v7, 0.0 }
 0x219   : > { %v2024_v36 = vmax.f32 %v1988_v32, 0.0  ;;  %v1991_v25 = vadd.f32 %v2801_v55, %v1830_v40  ;;  %2277 = vst [vmem:[%s3751_s25 + $0x171] sm:$0xff] %v2023_v49 }
 0x21b   : > { %2278 = vst [vmem:[%s3751_s25 + $0x181] sm:$0xff] %v2024_v36  ;;  %v2025_v3 = vmax.f32 %v1991_v25, 0.0 }
 0x21d   : > { %2279 = vst [vmem:[%s3751_s25 + $0x189] sm:$0xff] %v2025_v3 }
 0x21e PF: > { %s13_s12 = sadd.s32 1, %s2906_s12  }
 0x21f   : > { %p10_p4 = scmp.ge.s32.totalorder %s13_s12, 4  }
 0x221   :  { %12 = sbr.rel (!%p10_p4) target bundleno = 1 (0x1), region = 63 }

</bundles_post_ra>
